<compile_context>
chip_gen: v6e
topology: v6e:2x2x1
jax: 0.10.0
libtpu: 0.0.40
codegen_flags: <defaults>
</compile_context>

<pallas_src>
import math

import jax
import jax.numpy as jnp
from jax.experimental import pallas as pl
from jax.experimental.pallas import tpu as pltpu

# ----------------------------- small ViT config ------------------------------
B = 2            # batch
C = 3            # image channels
IMG = 32         # image H = W
PATCH = 16       # patch size (Conv2d kernel = stride = 16)
D = 32           # embed dim
HEADS = 2
HEAD_DIM = D // HEADS
DEPTH = 2        # number of transformer blocks
MLP_HIDDEN = 4 * D
N = (IMG // PATCH) ** 2          # number of patches per image (2x2 = 4)
S = N + 1                        # sequence length with cls token
BS = B * S                       # batch-folded sequence length (10 rows)
K = C * PATCH * PATCH            # patch-embed contraction dim (768, lane aligned)
EPS = 1e-6                       # timm ViT LayerNorm eps
SCALE = HEAD_DIM ** -0.5
NEG = -1e30                      # additive mask value for cross-image attention


# ------------------------------- small helpers -------------------------------
def _layernorm(x, w, b):
    mu = jnp.mean(x, axis=-1, keepdims=True)
    var = jnp.mean((x - mu) ** 2, axis=-1, keepdims=True)
    return (x - mu) * jax.lax.rsqrt(var + EPS) * w + b


def _erf(x):
    # Abramowitz & Stegun 7.1.26 polynomial erf, |error| < 1.5e-7.
    # exp / mul / add / select only; the reciprocal goes to the EUP.
    a1, a2, a3, a4, a5 = (0.254829592, -0.284496736, 1.421413741,
                          -1.453152027, 1.061405429)
    p = 0.3275911
    ax = jnp.abs(x)
    t = pl.reciprocal(1.0 + p * ax, approx=True)
    poly = t * (a1 + t * (a2 + t * (a3 + t * (a4 + t * a5))))
    y = 1.0 - poly * jnp.exp(-ax * ax)
    return jnp.where(x >= 0, y, -y)


def _gelu(x):
    # Exact (erf) GELU, matching torch.nn.GELU / timm default.
    return 0.5 * x * (1.0 + _erf(x * (1.0 / math.sqrt(2.0))))


# ------------------------------- fused kernel --------------------------------
def vit_kernel(patches_ref,        # (BS, K)  bf16, rows 0 and S are all-zero cls rows
               pw_ref,             # (K, D)   bf16  patch-embed weight
               add_ref,            # (BS, D)  f32   cls+pos / patch_bias+pos addend
               bias_ref,           # (BS, BS) f32   block-diagonal attention mask
               wqkv_ref,           # (DEPTH, D, 3D)        bf16
               bqkv_ref,           # (DEPTH, 1, 3D)        f32
               wo_ref,             # (DEPTH, D, D)         bf16
               w1_ref,             # (DEPTH, D, MLP_HIDDEN)  bf16
               b1_ref,             # (DEPTH, 1, MLP_HIDDEN)  f32
               w2_ref,             # (DEPTH, MLP_HIDDEN, D)  bf16
               dvec_ref,           # (DEPTH, 6, D) f32: ln1w,ln1b,ln2w,ln2b,proj_b,fc2_b
               fn_ref,             # (2, D) f32: final norm w, b
               o_ref):             # (BS, D) f32
    """Full ViT forward for the whole (batch-folded) batch, entirely in VMEM."""
    f32 = jnp.float32
    bf16 = jnp.bfloat16

    # ---- patch embed (Conv2d k=s=16 as one matmul) + cls token + pos embed ----
    x = (jnp.dot(patches_ref[...], pw_ref[...], preferred_element_type=f32)
         + add_ref[...])                                                  # (BS, D)

    attn_bias = bias_ref[...]                                             # (BS, BS)

    # ---- transformer blocks (DEPTH unrolled; static ref views are free) ----
    for d in range(DEPTH):
        vecs = dvec_ref[d]                                                # (6, D)
        ln1w, ln1b = vecs[0:1, :], vecs[1:2, :]
        ln2w, ln2b = vecs[2:3, :], vecs[3:4, :]
        proj_b, fc2_b = vecs[4:5, :], vecs[5:6, :]

        # -- attention branch: one fused QKV matmul, per-head lane slices --
        h = _layernorm(x, ln1w, ln1b)
        qkv = (jnp.dot(h.astype(bf16), wqkv_ref[d], preferred_element_type=f32)
               + bqkv_ref[d])                                             # (BS, 3D)
        ctx = []
        for hh in range(HEADS):
            q = qkv[:, 0 * D + hh * HEAD_DIM: 0 * D + (hh + 1) * HEAD_DIM]
            k = qkv[:, 1 * D + hh * HEAD_DIM: 1 * D + (hh + 1) * HEAD_DIM]
            v = qkv[:, 2 * D + hh * HEAD_DIM: 2 * D + (hh + 1) * HEAD_DIM]
            s = jax.lax.dot_general(q.astype(bf16), k.astype(bf16),
                                    (((1,), (1,)), ((), ())),
                                    preferred_element_type=f32)           # (BS, BS)
            s = s * SCALE + attn_bias                                     # mask cross-image
            p = jnp.exp(s - jnp.max(s, axis=-1, keepdims=True))
            p = p * pl.reciprocal(jnp.sum(p, axis=-1, keepdims=True), approx=True)
            ctx.append(jnp.dot(p.astype(bf16), v.astype(bf16),
                               preferred_element_type=f32))               # (BS, HD)
        ctx = jnp.concatenate(ctx, axis=-1)                               # (BS, D)
        x = x + jnp.dot(ctx.astype(bf16), wo_ref[d],
                        preferred_element_type=f32) + proj_b

        # -- MLP branch --
        h2 = _layernorm(x, ln2w, ln2b)
        m = (jnp.dot(h2.astype(bf16), w1_ref[d], preferred_element_type=f32)
             + b1_ref[d])
        m = _gelu(m)
        x = x + jnp.dot(m.astype(bf16), w2_ref[d],
                        preferred_element_type=f32) + fc2_b

    # ---- final LayerNorm ----
    fn = fn_ref[...]
    o_ref[...] = _layernorm(x, fn[0:1, :], fn[1:2, :]).astype(o_ref.dtype)


# --------------------------------- wrappers -----------------------------------
def _im2col(x):
    # (B, C, H, W) -> (B, N, C*P*P); rows flattened in (C, P, P) order,
    # matching PyTorch Conv2d(kernel=stride=PATCH) weight flattening.
    hp = IMG // PATCH
    return (x.reshape(B, C, hp, PATCH, hp, PATCH)
             .transpose(0, 2, 4, 1, 3, 5)
             .reshape(B, N, K))


def pack_params(params):
    """Pack logical params into a small number of depth-stacked kernel operands
    (matmul weights pre-cast to bf16; order matches vit_kernel args)."""
    dvecs, wqkv, bqkv, wo, w1, b1, w2 = [], [], [], [], [], [], []
    for blk in params["blocks"]:
        (l1w, l1b, qkvw, qkvb, projw, projb,
         l2w, l2b, fc1w, fc1b, fc2w, fc2b) = blk
        dvecs.append(jnp.stack([l1w, l1b, l2w, l2b, projb, fc2b], axis=0))  # (6, D)
        wqkv.append(qkvw)                 # (D, 3D): lanes already [q | k | v], head-major
        bqkv.append(qkvb[None, :])        # (1, 3D)
        wo.append(projw)                  # (D, D): lanes already [head0 | head1]
        w1.append(fc1w)                   # (D, MLP_HIDDEN)
        b1.append(fc1b[None, :])          # (1, MLP_HIDDEN)
        w2.append(fc2w)                   # (MLP_HIDDEN, D)

    st = lambda xs: jnp.stack(xs, axis=0)
    stb = lambda xs: jnp.stack(xs, axis=0).astype(jnp.bfloat16)

    # (S, D) additive table: row 0 = cls + pos[0]; rows 1..N = patch_bias + pos[1:];
    # replicated once per image -> (BS, D).
    addend = jnp.concatenate(
        [params["cls_token"].reshape(1, D) + params["pos_embed"][0, 0:1, :],
         params["patch_b"][None, :] + params["pos_embed"][0, 1:, :]], axis=0)
    addend = jnp.tile(addend, (B, 1)).astype(jnp.float32)                # (BS, D)

    # Block-diagonal additive attention mask: 0 within an image, NEG across images.
    bid = jnp.arange(BS, dtype=jnp.int32) // S
    attn_bias = jnp.where(bid[:, None] == bid[None, :], 0.0, NEG).astype(jnp.float32)

    fnorm = jnp.stack([params["norm_w"], params["norm_b"]], axis=0)      # (2, D)

    return (
        params["patch_w"].astype(jnp.bfloat16),   # (K, D)
        addend, attn_bias,
        stb(wqkv), st(bqkv), stb(wo),
        stb(w1), st(b1), stb(w2),
        st(dvecs), fnorm,
    )


def vit_forward(x, packed):
    patches = _im2col(x)                                                  # (B, N, K)
    # Prepend an all-zero "cls" row per image so the in-kernel matmul directly
    # yields the (S, D) token tile; fold batch into sublanes.
    patches = jnp.concatenate(
        [jnp.zeros((B, 1, K), patches.dtype), patches], axis=1)          # (B, S, K)
    patches = patches.reshape(BS, K).astype(jnp.bfloat16)                # (BS, K)

    n_inputs = 1 + len(packed)
    out = pl.pallas_call(
        vit_kernel,
        out_shape=jax.ShapeDtypeStruct((BS, D), jnp.float32),
        in_specs=[pl.BlockSpec(memory_space=pltpu.MemorySpace.VMEM)
                  for _ in range(n_inputs)],
        out_specs=pl.BlockSpec(memory_space=pltpu.MemorySpace.VMEM),
    )(patches, *packed)

    # TODO(synk): fold the cls-drop and (B,N,D)->(B,D,d,d) permute into the
    # kernel (small in-kernel transpose); left as thin XLA glue at this size.
    h = out.reshape(B, S, D)[:, 1:, :]                                    # (B, N, D)
    d_sp = int(math.isqrt(N))
    return h.reshape(B, d_sp, d_sp, D).transpose(0, 3, 1, 2)              # (B, D, d, d)


# ----------------------- pure-JAX reference (validation) ----------------------
def vit_reference(x, params, matmul_dtype=jnp.float32):
    dt = matmul_dtype

    def mm(a, b):
        return jnp.dot(a.astype(dt), b.astype(dt),
                       preferred_element_type=jnp.float32)

    patches = _im2col(x)
    tokens = mm(patches, params["patch_w"]) + params["patch_b"]           # (B, N, D)
    cls = jnp.broadcast_to(params["cls_token"], (B, 1, D))
    h = jnp.concatenate([cls, tokens], axis=1) + params["pos_embed"]
    for blk in params["blocks"]:
        (l1w, l1b, qkvw, qkvb, projw, projb,
         l2w, l2b, fc1w, fc1b, fc2w, fc2b) = blk
        y = _layernorm(h, l1w, l1b)
        qkv = mm(y, qkvw) + qkvb
        q, k, v = jnp.split(qkv, 3, axis=-1)
        q = q.reshape(B, S, HEADS, HEAD_DIM).transpose(0, 2, 1, 3)
        k = k.reshape(B, S, HEADS, HEAD_DIM).transpose(0, 2, 1, 3)
        v = v.reshape(B, S, HEADS, HEAD_DIM).transpose(0, 2, 1, 3)
        scores = jnp.einsum("bhqe,bhke->bhqk", q.astype(dt), k.astype(dt),
                            preferred_element_type=jnp.float32) * SCALE
        att = jax.nn.softmax(scores, axis=-1)
        ctx = jnp.einsum("bhqk,bhke->bhqe", att.astype(dt), v.astype(dt),
                         preferred_element_type=jnp.float32)
        ctx = ctx.transpose(0, 2, 1, 3).reshape(B, S, D)
        h = h + mm(ctx, projw) + projb
        y2 = _layernorm(h, l2w, l2b)
        m = jax.nn.gelu(mm(y2, fc1w) + fc1b, approximate=False)
        h = h + mm(m, fc2w) + fc2b
    h = _layernorm(h, params["norm_w"], params["norm_b"])
    h = h[:, 1:, :]
    d_sp = int(math.isqrt(N))
    return h.reshape(B, d_sp, d_sp, D).transpose(0, 3, 1, 2)


# ------------------------------- param init ----------------------------------
def init_params(key):
    keys = jax.random.split(key, 5 + DEPTH)

    def nrm(k, shape, std=0.02):
        return (std * jax.random.normal(k, shape)).astype(jnp.float32)

    params = {
        "patch_w": nrm(keys[0], (K, D)),
        "patch_b": nrm(keys[1], (D,)),
        "cls_token": nrm(keys[2], (1, 1, D)),
        "pos_embed": nrm(keys[3], (1, S, D)),
        "norm_w": jnp.ones((D,), jnp.float32),
        "norm_b": jnp.zeros((D,), jnp.float32),
        "blocks": [],
    }
    for i in range(DEPTH):
        kq, kqb, kp_, kpb, k1, k1b, k2, k2b = jax.random.split(keys[5 + i], 8)
        blk = (
            jnp.ones((D,), jnp.float32), jnp.zeros((D,), jnp.float32),   # ln1
            nrm(kq, (D, 3 * D)), nrm(kqb, (3 * D,)),                     # qkv
            nrm(kp_, (D, D)), nrm(kpb, (D,)),                            # proj
            jnp.ones((D,), jnp.float32), jnp.zeros((D,), jnp.float32),   # ln2
            nrm(k1, (D, MLP_HIDDEN)), nrm(k1b, (MLP_HIDDEN,)),           # fc1
            nrm(k2, (MLP_HIDDEN, D)), nrm(k2b, (D,)),                    # fc2
        )
        params["blocks"].append(blk)
    return params


# ----------------------------------- main -------------------------------------
if __name__ == "__main__":
    key = jax.random.PRNGKey(0)
    kx, kp = jax.random.split(key)
    x = jax.random.normal(kx, (B, C, IMG, IMG), dtype=jnp.float32)
    params = init_params(kp)
    packed = pack_params(params)

    out = jax.jit(vit_forward)(x, packed)
    out = jax.block_until_ready(out)

    d_sp = int(math.isqrt(N))
    assert out.shape == (B, D, d_sp, d_sp), out.shape
    assert bool(jnp.all(jnp.isfinite(out)))

    # Kernel-logic check: reference that also feeds bf16 operands to the MXU
    # (isolates fusion/masking/softmax/GELU logic from bf16 input rounding).
    ref_bf16 = vit_reference(x, params, matmul_dtype=jnp.bfloat16)
    err_logic = float(jnp.max(jnp.abs(out - ref_bf16)))
    assert err_logic < 2e-3, f"max abs error vs bf16-matmul reference: {err_logic}"

    # End-to-end check vs pure-f32 reference; difference is dominated by the
    # bf16 rounding of MXU operands (accumulation stays f32).
    ref_f32 = vit_reference(x, params, matmul_dtype=jnp.float32)
    err_full = float(jnp.max(jnp.abs(out - ref_f32)))
    assert err_full < 2e-2, f"max abs error vs f32 reference: {err_full}"

    print("KERNEL_OK")
</pallas_src>

<mosaic_0001>
module attributes {stable_mosaic.version = 11 : i64} {
  func.func @vit_kernel(%arg0: memref<10x768xbf16, #tpu.memory_space<vmem>>, %arg1: memref<768x32xbf16, #tpu.memory_space<vmem>>, %arg2: memref<10x32xf32, #tpu.memory_space<vmem>>, %arg3: memref<10x10xf32, #tpu.memory_space<vmem>>, %arg4: memref<2x32x96xbf16, #tpu.memory_space<vmem>>, %arg5: memref<2x1x96xf32, #tpu.memory_space<vmem>>, %arg6: memref<2x32x32xbf16, #tpu.memory_space<vmem>>, %arg7: memref<2x32x128xbf16, #tpu.memory_space<vmem>>, %arg8: memref<2x1x128xf32, #tpu.memory_space<vmem>>, %arg9: memref<2x128x32xbf16, #tpu.memory_space<vmem>>, %arg10: memref<2x6x32xf32, #tpu.memory_space<vmem>>, %arg11: memref<2x32xf32, #tpu.memory_space<vmem>>, %arg12: memref<10x32xf32, #tpu.memory_space<vmem>>) attributes {dimension_semantics = [], scalar_prefetch = 0 : i64, scratch_operands = 0 : i64, tpu.core_type = #tpu.core_type<tc>} {
    %c0 = arith.constant 0 : index
    %c0_0 = arith.constant 0 : index
    %0 = vector.load %arg0[%c0, %c0_0] : memref<10x768xbf16, #tpu.memory_space<vmem>>, vector<10x768xbf16>
    %c0_1 = arith.constant 0 : index
    %c0_2 = arith.constant 0 : index
    %1 = vector.load %arg1[%c0_1, %c0_2] : memref<768x32xbf16, #tpu.memory_space<vmem>>, vector<768x32xbf16>
    %cst = arith.constant dense<0.000000e+00> : vector<10x32xf32>
    %2 = tpu.matmul %0, %1, %cst {dimension_numbers = #tpu.dot_dimension_numbers<[1], [0], [0], [1], [0, 0, 1, 1], [], []>} : vector<10x768xbf16>, vector<768x32xbf16>, vector<10x32xf32> -> vector<10x32xf32>
    %c0_3 = arith.constant 0 : index
    %c0_4 = arith.constant 0 : index
    %3 = vector.load %arg2[%c0_3, %c0_4] : memref<10x32xf32, #tpu.memory_space<vmem>>, vector<10x32xf32>
    %4 = arith.addf %2, %3 : vector<10x32xf32>
    %c0_5 = arith.constant 0 : index
    %c0_6 = arith.constant 0 : index
    %5 = vector.load %arg3[%c0_5, %c0_6] : memref<10x10xf32, #tpu.memory_space<vmem>>, vector<10x10xf32>
    %c0_7 = arith.constant 0 : index
    %c0_8 = arith.constant 0 : index
    %c0_9 = arith.constant 0 : index
    %6 = vector.load %arg10[%c0_7, %c0_8, %c0_9] : memref<2x6x32xf32, #tpu.memory_space<vmem>>, vector<1x6x32xf32>
    %7 = vector.shape_cast %6 : vector<1x6x32xf32> to vector<6x32xf32>
    %8 = vector.extract_strided_slice %7 {offsets = [0, 0], sizes = [1, 32], strides = [1, 1]} : vector<6x32xf32> to vector<1x32xf32>
    %9 = vector.extract_strided_slice %7 {offsets = [1, 0], sizes = [1, 32], strides = [1, 1]} : vector<6x32xf32> to vector<1x32xf32>
    %10 = vector.extract_strided_slice %7 {offsets = [2, 0], sizes = [1, 32], strides = [1, 1]} : vector<6x32xf32> to vector<1x32xf32>
    %11 = vector.extract_strided_slice %7 {offsets = [3, 0], sizes = [1, 32], strides = [1, 1]} : vector<6x32xf32> to vector<1x32xf32>
    %12 = vector.extract_strided_slice %7 {offsets = [4, 0], sizes = [1, 32], strides = [1, 1]} : vector<6x32xf32> to vector<1x32xf32>
    %13 = vector.extract_strided_slice %7 {offsets = [5, 0], sizes = [1, 32], strides = [1, 1]} : vector<6x32xf32> to vector<1x32xf32>
    %cst_10 = arith.constant dense<0.000000e+00> : vector<10xf32>
    %14 = vector.multi_reduction <add>, %4, %cst_10 [1] : vector<10x32xf32> to vector<10xf32>
    %15 = vector.shape_cast %14 : vector<10xf32> to vector<10x1xf32>
    %cst_11 = arith.constant 3.200000e+01 : f32
    %16 = vector.broadcast %cst_11 : f32 to vector<10x1xf32>
    %17 = arith.divf %15, %16 : vector<10x1xf32>
    %18 = vector.broadcast %17 : vector<10x1xf32> to vector<10x32xf32>
    %19 = arith.subf %4, %18 : vector<10x32xf32>
    %20 = arith.mulf %19, %19 : vector<10x32xf32>
    %cst_12 = arith.constant dense<0.000000e+00> : vector<10xf32>
    %21 = vector.multi_reduction <add>, %20, %cst_12 [1] : vector<10x32xf32> to vector<10xf32>
    %22 = vector.shape_cast %21 : vector<10xf32> to vector<10x1xf32>
    %cst_13 = arith.constant 3.200000e+01 : f32
    %23 = vector.broadcast %cst_13 : f32 to vector<10x1xf32>
    %24 = arith.divf %22, %23 : vector<10x1xf32>
    %25 = vector.broadcast %17 : vector<10x1xf32> to vector<10x32xf32>
    %26 = arith.subf %4, %25 : vector<10x32xf32>
    %cst_14 = arith.constant 9.99999997E-7 : f32
    %27 = vector.broadcast %cst_14 : f32 to vector<10x1xf32>
    %28 = arith.addf %24, %27 : vector<10x1xf32>
    %29 = math.rsqrt %28 : vector<10x1xf32>
    %30 = vector.broadcast %29 : vector<10x1xf32> to vector<10x32xf32>
    %31 = arith.mulf %26, %30 : vector<10x32xf32>
    %32 = vector.broadcast %8 : vector<1x32xf32> to vector<10x32xf32>
    %33 = arith.mulf %31, %32 : vector<10x32xf32>
    %34 = vector.broadcast %9 : vector<1x32xf32> to vector<10x32xf32>
    %35 = arith.addf %33, %34 : vector<10x32xf32>
    %36 = arith.truncf %35 : vector<10x32xf32> to vector<10x32xbf16>
    %c0_15 = arith.constant 0 : index
    %c0_16 = arith.constant 0 : index
    %c0_17 = arith.constant 0 : index
    %37 = vector.load %arg4[%c0_15, %c0_16, %c0_17] : memref<2x32x96xbf16, #tpu.memory_space<vmem>>, vector<1x32x96xbf16>
    %38 = vector.shape_cast %37 : vector<1x32x96xbf16> to vector<32x96xbf16>
    %cst_18 = arith.constant dense<0.000000e+00> : vector<10x96xf32>
    %39 = tpu.matmul %36, %38, %cst_18 {dimension_numbers = #tpu.dot_dimension_numbers<[1], [0], [0], [1], [0, 0, 1, 1], [], []>} : vector<10x32xbf16>, vector<32x96xbf16>, vector<10x96xf32> -> vector<10x96xf32>
    %c0_19 = arith.constant 0 : index
    %c0_20 = arith.constant 0 : index
    %c0_21 = arith.constant 0 : index
    %40 = vector.load %arg5[%c0_19, %c0_20, %c0_21] : memref<2x1x96xf32, #tpu.memory_space<vmem>>, vector<1x1x96xf32>
    %41 = vector.shape_cast %40 : vector<1x1x96xf32> to vector<1x96xf32>
    %42 = vector.broadcast %41 : vector<1x96xf32> to vector<10x96xf32>
    %43 = arith.addf %39, %42 : vector<10x96xf32>
    %44 = vector.extract_strided_slice %43 {offsets = [0, 0], sizes = [10, 16], strides = [1, 1]} : vector<10x96xf32> to vector<10x16xf32>
    %45 = vector.extract_strided_slice %43 {offsets = [0, 32], sizes = [10, 16], strides = [1, 1]} : vector<10x96xf32> to vector<10x16xf32>
    %46 = vector.extract_strided_slice %43 {offsets = [0, 64], sizes = [10, 16], strides = [1, 1]} : vector<10x96xf32> to vector<10x16xf32>
    %47 = arith.truncf %44 : vector<10x16xf32> to vector<10x16xbf16>
    %48 = arith.truncf %45 : vector<10x16xf32> to vector<10x16xbf16>
    %cst_22 = arith.constant dense<0.000000e+00> : vector<10x10xf32>
    %49 = tpu.matmul %47, %48, %cst_22 {dimension_numbers = #tpu.dot_dimension_numbers<[1], [1], [0], [0], [0, 0, 1, 0], [], []>} : vector<10x16xbf16>, vector<10x16xbf16>, vector<10x10xf32> -> vector<10x10xf32>
    %cst_23 = arith.constant 2.500000e-01 : f32
    %50 = vector.broadcast %cst_23 : f32 to vector<10x10xf32>
    %51 = arith.mulf %49, %50 : vector<10x10xf32>
    %52 = arith.addf %51, %5 : vector<10x10xf32>
    %cst_24 = arith.constant dense<0xFF800000> : vector<10xf32>
    %53 = vector.multi_reduction <maximumf>, %52, %cst_24 [1] : vector<10x10xf32> to vector<10xf32>
    %54 = vector.shape_cast %53 : vector<10xf32> to vector<10x1xf32>
    %55 = vector.broadcast %54 : vector<10x1xf32> to vector<10x10xf32>
    %56 = arith.subf %52, %55 : vector<10x10xf32>
    %57 = math.exp %56 : vector<10x10xf32>
    %cst_25 = arith.constant dense<0.000000e+00> : vector<10xf32>
    %58 = vector.multi_reduction <add>, %57, %cst_25 [1] : vector<10x10xf32> to vector<10xf32>
    %59 = vector.shape_cast %58 : vector<10xf32> to vector<10x1xf32>
    %60 = tpu.reciprocal %59 {approx = true} : vector<10x1xf32> -> vector<10x1xf32>
    %61 = vector.broadcast %60 : vector<10x1xf32> to vector<10x10xf32>
    %62 = arith.mulf %57, %61 : vector<10x10xf32>
    %63 = arith.truncf %62 : vector<10x10xf32> to vector<10x10xbf16>
    %64 = arith.truncf %46 : vector<10x16xf32> to vector<10x16xbf16>
    %cst_26 = arith.constant dense<0.000000e+00> : vector<10x16xf32>
    %65 = tpu.matmul %63, %64, %cst_26 {dimension_numbers = #tpu.dot_dimension_numbers<[1], [0], [0], [1], [0, 0, 1, 1], [], []>} : vector<10x10xbf16>, vector<10x16xbf16>, vector<10x16xf32> -> vector<10x16xf32>
    %66 = vector.extract_strided_slice %43 {offsets = [0, 16], sizes = [10, 16], strides = [1, 1]} : vector<10x96xf32> to vector<10x16xf32>
    %67 = vector.extract_strided_slice %43 {offsets = [0, 48], sizes = [10, 16], strides = [1, 1]} : vector<10x96xf32> to vector<10x16xf32>
    %68 = vector.extract_strided_slice %43 {offsets = [0, 80], sizes = [10, 16], strides = [1, 1]} : vector<10x96xf32> to vector<10x16xf32>
    %69 = arith.truncf %66 : vector<10x16xf32> to vector<10x16xbf16>
    %70 = arith.truncf %67 : vector<10x16xf32> to vector<10x16xbf16>
    %cst_27 = arith.constant dense<0.000000e+00> : vector<10x10xf32>
    %71 = tpu.matmul %69, %70, %cst_27 {dimension_numbers = #tpu.dot_dimension_numbers<[1], [1], [0], [0], [0, 0, 1, 0], [], []>} : vector<10x16xbf16>, vector<10x16xbf16>, vector<10x10xf32> -> vector<10x10xf32>
    %cst_28 = arith.constant 2.500000e-01 : f32
    %72 = vector.broadcast %cst_28 : f32 to vector<10x10xf32>
    %73 = arith.mulf %71, %72 : vector<10x10xf32>
    %74 = arith.addf %73, %5 : vector<10x10xf32>
    %cst_29 = arith.constant dense<0xFF800000> : vector<10xf32>
    %75 = vector.multi_reduction <maximumf>, %74, %cst_29 [1] : vector<10x10xf32> to vector<10xf32>
    %76 = vector.shape_cast %75 : vector<10xf32> to vector<10x1xf32>
    %77 = vector.broadcast %76 : vector<10x1xf32> to vector<10x10xf32>
    %78 = arith.subf %74, %77 : vector<10x10xf32>
    %79 = math.exp %78 : vector<10x10xf32>
    %cst_30 = arith.constant dense<0.000000e+00> : vector<10xf32>
    %80 = vector.multi_reduction <add>, %79, %cst_30 [1] : vector<10x10xf32> to vector<10xf32>
    %81 = vector.shape_cast %80 : vector<10xf32> to vector<10x1xf32>
    %82 = tpu.reciprocal %81 {approx = true} : vector<10x1xf32> -> vector<10x1xf32>
    %83 = vector.broadcast %82 : vector<10x1xf32> to vector<10x10xf32>
    %84 = arith.mulf %79, %83 : vector<10x10xf32>
    %85 = arith.truncf %84 : vector<10x10xf32> to vector<10x10xbf16>
    %86 = arith.truncf %68 : vector<10x16xf32> to vector<10x16xbf16>
    %cst_31 = arith.constant dense<0.000000e+00> : vector<10x16xf32>
    %87 = tpu.matmul %85, %86, %cst_31 {dimension_numbers = #tpu.dot_dimension_numbers<[1], [0], [0], [1], [0, 0, 1, 1], [], []>} : vector<10x10xbf16>, vector<10x16xbf16>, vector<10x16xf32> -> vector<10x16xf32>
    %88 = tpu.concatenate %65, %87 in 1 : vector<10x16xf32>, vector<10x16xf32> -> vector<10x32xf32>
    %89 = arith.truncf %88 : vector<10x32xf32> to vector<10x32xbf16>
    %c0_32 = arith.constant 0 : index
    %c0_33 = arith.constant 0 : index
    %c0_34 = arith.constant 0 : index
    %90 = vector.load %arg6[%c0_32, %c0_33, %c0_34] : memref<2x32x32xbf16, #tpu.memory_space<vmem>>, vector<1x32x32xbf16>
    %91 = vector.shape_cast %90 : vector<1x32x32xbf16> to vector<32x32xbf16>
    %cst_35 = arith.constant dense<0.000000e+00> : vector<10x32xf32>
    %92 = tpu.matmul %89, %91, %cst_35 {dimension_numbers = #tpu.dot_dimension_numbers<[1], [0], [0], [1], [0, 0, 1, 1], [], []>} : vector<10x32xbf16>, vector<32x32xbf16>, vector<10x32xf32> -> vector<10x32xf32>
    %93 = arith.addf %4, %92 : vector<10x32xf32>
    %94 = vector.broadcast %12 : vector<1x32xf32> to vector<10x32xf32>
    %95 = arith.addf %93, %94 : vector<10x32xf32>
    %cst_36 = arith.constant dense<0.000000e+00> : vector<10xf32>
    %96 = vector.multi_reduction <add>, %95, %cst_36 [1] : vector<10x32xf32> to vector<10xf32>
    %97 = vector.shape_cast %96 : vector<10xf32> to vector<10x1xf32>
    %cst_37 = arith.constant 3.200000e+01 : f32
    %98 = vector.broadcast %cst_37 : f32 to vector<10x1xf32>
    %99 = arith.divf %97, %98 : vector<10x1xf32>
    %100 = vector.broadcast %99 : vector<10x1xf32> to vector<10x32xf32>
    %101 = arith.subf %95, %100 : vector<10x32xf32>
    %102 = arith.mulf %101, %101 : vector<10x32xf32>
    %cst_38 = arith.constant dense<0.000000e+00> : vector<10xf32>
    %103 = vector.multi_reduction <add>, %102, %cst_38 [1] : vector<10x32xf32> to vector<10xf32>
    %104 = vector.shape_cast %103 : vector<10xf32> to vector<10x1xf32>
    %cst_39 = arith.constant 3.200000e+01 : f32
    %105 = vector.broadcast %cst_39 : f32 to vector<10x1xf32>
    %106 = arith.divf %104, %105 : vector<10x1xf32>
    %107 = vector.broadcast %99 : vector<10x1xf32> to vector<10x32xf32>
    %108 = arith.subf %95, %107 : vector<10x32xf32>
    %cst_40 = arith.constant 9.99999997E-7 : f32
    %109 = vector.broadcast %cst_40 : f32 to vector<10x1xf32>
    %110 = arith.addf %106, %109 : vector<10x1xf32>
    %111 = math.rsqrt %110 : vector<10x1xf32>
    %112 = vector.broadcast %111 : vector<10x1xf32> to vector<10x32xf32>
    %113 = arith.mulf %108, %112 : vector<10x32xf32>
    %114 = vector.broadcast %10 : vector<1x32xf32> to vector<10x32xf32>
    %115 = arith.mulf %113, %114 : vector<10x32xf32>
    %116 = vector.broadcast %11 : vector<1x32xf32> to vector<10x32xf32>
    %117 = arith.addf %115, %116 : vector<10x32xf32>
    %118 = arith.truncf %117 : vector<10x32xf32> to vector<10x32xbf16>
    %c0_41 = arith.constant 0 : index
    %c0_42 = arith.constant 0 : index
    %c0_43 = arith.constant 0 : index
    %119 = vector.load %arg7[%c0_41, %c0_42, %c0_43] : memref<2x32x128xbf16, #tpu.memory_space<vmem>>, vector<1x32x128xbf16>
    %120 = vector.shape_cast %119 : vector<1x32x128xbf16> to vector<32x128xbf16>
    %cst_44 = arith.constant dense<0.000000e+00> : vector<10x128xf32>
    %121 = tpu.matmul %118, %120, %cst_44 {dimension_numbers = #tpu.dot_dimension_numbers<[1], [0], [0], [1], [0, 0, 1, 1], [], []>} : vector<10x32xbf16>, vector<32x128xbf16>, vector<10x128xf32> -> vector<10x128xf32>
    %c0_45 = arith.constant 0 : index
    %c0_46 = arith.constant 0 : index
    %c0_47 = arith.constant 0 : index
    %122 = vector.load %arg8[%c0_45, %c0_46, %c0_47] : memref<2x1x128xf32, #tpu.memory_space<vmem>>, vector<1x1x128xf32>
    %123 = vector.shape_cast %122 : vector<1x1x128xf32> to vector<1x128xf32>
    %124 = vector.broadcast %123 : vector<1x128xf32> to vector<10x128xf32>
    %125 = arith.addf %121, %124 : vector<10x128xf32>
    %cst_48 = arith.constant 5.000000e-01 : f32
    %126 = vector.broadcast %cst_48 : f32 to vector<10x128xf32>
    %127 = arith.mulf %126, %125 : vector<10x128xf32>
    %cst_49 = arith.constant 0.707106769 : f32
    %128 = vector.broadcast %cst_49 : f32 to vector<10x128xf32>
    %129 = arith.mulf %125, %128 : vector<10x128xf32>
    %130 = math.absf %129 : vector<10x128xf32>
    %cst_50 = arith.constant 0.327591091 : f32
    %131 = vector.broadcast %cst_50 : f32 to vector<10x128xf32>
    %132 = arith.mulf %131, %130 : vector<10x128xf32>
    %cst_51 = arith.constant 1.000000e+00 : f32
    %133 = vector.broadcast %cst_51 : f32 to vector<10x128xf32>
    %134 = arith.addf %133, %132 : vector<10x128xf32>
    %135 = tpu.reciprocal %134 {approx = true} : vector<10x128xf32> -> vector<10x128xf32>
    %cst_52 = arith.constant 1.06140542 : f32
    %136 = vector.broadcast %cst_52 : f32 to vector<10x128xf32>
    %137 = arith.mulf %135, %136 : vector<10x128xf32>
    %cst_53 = arith.constant -1.45315206 : f32
    %138 = vector.broadcast %cst_53 : f32 to vector<10x128xf32>
    %139 = arith.addf %138, %137 : vector<10x128xf32>
    %140 = arith.mulf %135, %139 : vector<10x128xf32>
    %cst_54 = arith.constant 1.42141378 : f32
    %141 = vector.broadcast %cst_54 : f32 to vector<10x128xf32>
    %142 = arith.addf %141, %140 : vector<10x128xf32>
    %143 = arith.mulf %135, %142 : vector<10x128xf32>
    %cst_55 = arith.constant -0.284496725 : f32
    %144 = vector.broadcast %cst_55 : f32 to vector<10x128xf32>
    %145 = arith.addf %144, %143 : vector<10x128xf32>
    %146 = arith.mulf %135, %145 : vector<10x128xf32>
    %cst_56 = arith.constant 0.254829586 : f32
    %147 = vector.broadcast %cst_56 : f32 to vector<10x128xf32>
    %148 = arith.addf %147, %146 : vector<10x128xf32>
    %149 = arith.mulf %135, %148 : vector<10x128xf32>
    %cst_57 = arith.constant 0.000000e+00 : f32
    %150 = vector.broadcast %cst_57 : f32 to vector<10x128xf32>
    %151 = arith.subf %150, %130 : vector<10x128xf32>
    %152 = arith.mulf %151, %130 : vector<10x128xf32>
    %153 = math.exp %152 : vector<10x128xf32>
    %154 = arith.mulf %149, %153 : vector<10x128xf32>
    %cst_58 = arith.constant 1.000000e+00 : f32
    %155 = vector.broadcast %cst_58 : f32 to vector<10x128xf32>
    %156 = arith.subf %155, %154 : vector<10x128xf32>
    %cst_59 = arith.constant 0.000000e+00 : f32
    %157 = vector.broadcast %cst_59 : f32 to vector<10x128xf32>
    %158 = arith.cmpf oge, %129, %157 : vector<10x128xf32>
    %cst_60 = arith.constant 0.000000e+00 : f32
    %159 = vector.broadcast %cst_60 : f32 to vector<10x128xf32>
    %160 = arith.subf %159, %156 : vector<10x128xf32>
    %161 = arith.select %158, %156, %160 : vector<10x128xi1>, vector<10x128xf32>
    %cst_61 = arith.constant 1.000000e+00 : f32
    %162 = vector.broadcast %cst_61 : f32 to vector<10x128xf32>
    %163 = arith.addf %162, %161 : vector<10x128xf32>
    %164 = arith.mulf %127, %163 : vector<10x128xf32>
    %165 = arith.truncf %164 : vector<10x128xf32> to vector<10x128xbf16>
    %c0_62 = arith.constant 0 : index
    %c0_63 = arith.constant 0 : index
    %c0_64 = arith.constant 0 : index
    %166 = vector.load %arg9[%c0_62, %c0_63, %c0_64] : memref<2x128x32xbf16, #tpu.memory_space<vmem>>, vector<1x128x32xbf16>
    %167 = vector.shape_cast %166 : vector<1x128x32xbf16> to vector<128x32xbf16>
    %cst_65 = arith.constant dense<0.000000e+00> : vector<10x32xf32>
    %168 = tpu.matmul %165, %167, %cst_65 {dimension_numbers = #tpu.dot_dimension_numbers<[1], [0], [0], [1], [0, 0, 1, 1], [], []>} : vector<10x128xbf16>, vector<128x32xbf16>, vector<10x32xf32> -> vector<10x32xf32>
    %169 = arith.addf %95, %168 : vector<10x32xf32>
    %170 = vector.broadcast %13 : vector<1x32xf32> to vector<10x32xf32>
    %171 = arith.addf %169, %170 : vector<10x32xf32>
    %c1 = arith.constant 1 : index
    %c0_66 = arith.constant 0 : index
    %c0_67 = arith.constant 0 : index
    %172 = vector.load %arg10[%c1, %c0_66, %c0_67] : memref<2x6x32xf32, #tpu.memory_space<vmem>>, vector<1x6x32xf32>
    %173 = vector.shape_cast %172 : vector<1x6x32xf32> to vector<6x32xf32>
    %174 = vector.extract_strided_slice %173 {offsets = [0, 0], sizes = [1, 32], strides = [1, 1]} : vector<6x32xf32> to vector<1x32xf32>
    %175 = vector.extract_strided_slice %173 {offsets = [1, 0], sizes = [1, 32], strides = [1, 1]} : vector<6x32xf32> to vector<1x32xf32>
    %176 = vector.extract_strided_slice %173 {offsets = [2, 0], sizes = [1, 32], strides = [1, 1]} : vector<6x32xf32> to vector<1x32xf32>
    %177 = vector.extract_strided_slice %173 {offsets = [3, 0], sizes = [1, 32], strides = [1, 1]} : vector<6x32xf32> to vector<1x32xf32>
    %178 = vector.extract_strided_slice %173 {offsets = [4, 0], sizes = [1, 32], strides = [1, 1]} : vector<6x32xf32> to vector<1x32xf32>
    %179 = vector.extract_strided_slice %173 {offsets = [5, 0], sizes = [1, 32], strides = [1, 1]} : vector<6x32xf32> to vector<1x32xf32>
    %cst_68 = arith.constant dense<0.000000e+00> : vector<10xf32>
    %180 = vector.multi_reduction <add>, %171, %cst_68 [1] : vector<10x32xf32> to vector<10xf32>
    %181 = vector.shape_cast %180 : vector<10xf32> to vector<10x1xf32>
    %cst_69 = arith.constant 3.200000e+01 : f32
    %182 = vector.broadcast %cst_69 : f32 to vector<10x1xf32>
    %183 = arith.divf %181, %182 : vector<10x1xf32>
    %184 = vector.broadcast %183 : vector<10x1xf32> to vector<10x32xf32>
    %185 = arith.subf %171, %184 : vector<10x32xf32>
    %186 = arith.mulf %185, %185 : vector<10x32xf32>
    %cst_70 = arith.constant dense<0.000000e+00> : vector<10xf32>
    %187 = vector.multi_reduction <add>, %186, %cst_70 [1] : vector<10x32xf32> to vector<10xf32>
    %188 = vector.shape_cast %187 : vector<10xf32> to vector<10x1xf32>
    %cst_71 = arith.constant 3.200000e+01 : f32
    %189 = vector.broadcast %cst_71 : f32 to vector<10x1xf32>
    %190 = arith.divf %188, %189 : vector<10x1xf32>
    %191 = vector.broadcast %183 : vector<10x1xf32> to vector<10x32xf32>
    %192 = arith.subf %171, %191 : vector<10x32xf32>
    %cst_72 = arith.constant 9.99999997E-7 : f32
    %193 = vector.broadcast %cst_72 : f32 to vector<10x1xf32>
    %194 = arith.addf %190, %193 : vector<10x1xf32>
    %195 = math.rsqrt %194 : vector<10x1xf32>
    %196 = vector.broadcast %195 : vector<10x1xf32> to vector<10x32xf32>
    %197 = arith.mulf %192, %196 : vector<10x32xf32>
    %198 = vector.broadcast %174 : vector<1x32xf32> to vector<10x32xf32>
    %199 = arith.mulf %197, %198 : vector<10x32xf32>
    %200 = vector.broadcast %175 : vector<1x32xf32> to vector<10x32xf32>
    %201 = arith.addf %199, %200 : vector<10x32xf32>
    %202 = arith.truncf %201 : vector<10x32xf32> to vector<10x32xbf16>
    %c1_73 = arith.constant 1 : index
    %c0_74 = arith.constant 0 : index
    %c0_75 = arith.constant 0 : index
    %203 = vector.load %arg4[%c1_73, %c0_74, %c0_75] : memref<2x32x96xbf16, #tpu.memory_space<vmem>>, vector<1x32x96xbf16>
    %204 = vector.shape_cast %203 : vector<1x32x96xbf16> to vector<32x96xbf16>
    %cst_76 = arith.constant dense<0.000000e+00> : vector<10x96xf32>
    %205 = tpu.matmul %202, %204, %cst_76 {dimension_numbers = #tpu.dot_dimension_numbers<[1], [0], [0], [1], [0, 0, 1, 1], [], []>} : vector<10x32xbf16>, vector<32x96xbf16>, vector<10x96xf32> -> vector<10x96xf32>
    %c1_77 = arith.constant 1 : index
    %c0_78 = arith.constant 0 : index
    %c0_79 = arith.constant 0 : index
    %206 = vector.load %arg5[%c1_77, %c0_78, %c0_79] : memref<2x1x96xf32, #tpu.memory_space<vmem>>, vector<1x1x96xf32>
    %207 = vector.shape_cast %206 : vector<1x1x96xf32> to vector<1x96xf32>
    %208 = vector.broadcast %207 : vector<1x96xf32> to vector<10x96xf32>
    %209 = arith.addf %205, %208 : vector<10x96xf32>
    %210 = vector.extract_strided_slice %209 {offsets = [0, 0], sizes = [10, 16], strides = [1, 1]} : vector<10x96xf32> to vector<10x16xf32>
    %211 = vector.extract_strided_slice %209 {offsets = [0, 32], sizes = [10, 16], strides = [1, 1]} : vector<10x96xf32> to vector<10x16xf32>
    %212 = vector.extract_strided_slice %209 {offsets = [0, 64], sizes = [10, 16], strides = [1, 1]} : vector<10x96xf32> to vector<10x16xf32>
    %213 = arith.truncf %210 : vector<10x16xf32> to vector<10x16xbf16>
    %214 = arith.truncf %211 : vector<10x16xf32> to vector<10x16xbf16>
    %cst_80 = arith.constant dense<0.000000e+00> : vector<10x10xf32>
    %215 = tpu.matmul %213, %214, %cst_80 {dimension_numbers = #tpu.dot_dimension_numbers<[1], [1], [0], [0], [0, 0, 1, 0], [], []>} : vector<10x16xbf16>, vector<10x16xbf16>, vector<10x10xf32> -> vector<10x10xf32>
    %cst_81 = arith.constant 2.500000e-01 : f32
    %216 = vector.broadcast %cst_81 : f32 to vector<10x10xf32>
    %217 = arith.mulf %215, %216 : vector<10x10xf32>
    %218 = arith.addf %217, %5 : vector<10x10xf32>
    %cst_82 = arith.constant dense<0xFF800000> : vector<10xf32>
    %219 = vector.multi_reduction <maximumf>, %218, %cst_82 [1] : vector<10x10xf32> to vector<10xf32>
    %220 = vector.shape_cast %219 : vector<10xf32> to vector<10x1xf32>
    %221 = vector.broadcast %220 : vector<10x1xf32> to vector<10x10xf32>
    %222 = arith.subf %218, %221 : vector<10x10xf32>
    %223 = math.exp %222 : vector<10x10xf32>
    %cst_83 = arith.constant dense<0.000000e+00> : vector<10xf32>
    %224 = vector.multi_reduction <add>, %223, %cst_83 [1] : vector<10x10xf32> to vector<10xf32>
    %225 = vector.shape_cast %224 : vector<10xf32> to vector<10x1xf32>
    %226 = tpu.reciprocal %225 {approx = true} : vector<10x1xf32> -> vector<10x1xf32>
    %227 = vector.broadcast %226 : vector<10x1xf32> to vector<10x10xf32>
    %228 = arith.mulf %223, %227 : vector<10x10xf32>
    %229 = arith.truncf %228 : vector<10x10xf32> to vector<10x10xbf16>
    %230 = arith.truncf %212 : vector<10x16xf32> to vector<10x16xbf16>
    %cst_84 = arith.constant dense<0.000000e+00> : vector<10x16xf32>
    %231 = tpu.matmul %229, %230, %cst_84 {dimension_numbers = #tpu.dot_dimension_numbers<[1], [0], [0], [1], [0, 0, 1, 1], [], []>} : vector<10x10xbf16>, vector<10x16xbf16>, vector<10x16xf32> -> vector<10x16xf32>
    %232 = vector.extract_strided_slice %209 {offsets = [0, 16], sizes = [10, 16], strides = [1, 1]} : vector<10x96xf32> to vector<10x16xf32>
    %233 = vector.extract_strided_slice %209 {offsets = [0, 48], sizes = [10, 16], strides = [1, 1]} : vector<10x96xf32> to vector<10x16xf32>
    %234 = vector.extract_strided_slice %209 {offsets = [0, 80], sizes = [10, 16], strides = [1, 1]} : vector<10x96xf32> to vector<10x16xf32>
    %235 = arith.truncf %232 : vector<10x16xf32> to vector<10x16xbf16>
    %236 = arith.truncf %233 : vector<10x16xf32> to vector<10x16xbf16>
    %cst_85 = arith.constant dense<0.000000e+00> : vector<10x10xf32>
    %237 = tpu.matmul %235, %236, %cst_85 {dimension_numbers = #tpu.dot_dimension_numbers<[1], [1], [0], [0], [0, 0, 1, 0], [], []>} : vector<10x16xbf16>, vector<10x16xbf16>, vector<10x10xf32> -> vector<10x10xf32>
    %cst_86 = arith.constant 2.500000e-01 : f32
    %238 = vector.broadcast %cst_86 : f32 to vector<10x10xf32>
    %239 = arith.mulf %237, %238 : vector<10x10xf32>
    %240 = arith.addf %239, %5 : vector<10x10xf32>
    %cst_87 = arith.constant dense<0xFF800000> : vector<10xf32>
    %241 = vector.multi_reduction <maximumf>, %240, %cst_87 [1] : vector<10x10xf32> to vector<10xf32>
    %242 = vector.shape_cast %241 : vector<10xf32> to vector<10x1xf32>
    %243 = vector.broadcast %242 : vector<10x1xf32> to vector<10x10xf32>
    %244 = arith.subf %240, %243 : vector<10x10xf32>
    %245 = math.exp %244 : vector<10x10xf32>
    %cst_88 = arith.constant dense<0.000000e+00> : vector<10xf32>
    %246 = vector.multi_reduction <add>, %245, %cst_88 [1] : vector<10x10xf32> to vector<10xf32>
    %247 = vector.shape_cast %246 : vector<10xf32> to vector<10x1xf32>
    %248 = tpu.reciprocal %247 {approx = true} : vector<10x1xf32> -> vector<10x1xf32>
    %249 = vector.broadcast %248 : vector<10x1xf32> to vector<10x10xf32>
    %250 = arith.mulf %245, %249 : vector<10x10xf32>
    %251 = arith.truncf %250 : vector<10x10xf32> to vector<10x10xbf16>
    %252 = arith.truncf %234 : vector<10x16xf32> to vector<10x16xbf16>
    %cst_89 = arith.constant dense<0.000000e+00> : vector<10x16xf32>
    %253 = tpu.matmul %251, %252, %cst_89 {dimension_numbers = #tpu.dot_dimension_numbers<[1], [0], [0], [1], [0, 0, 1, 1], [], []>} : vector<10x10xbf16>, vector<10x16xbf16>, vector<10x16xf32> -> vector<10x16xf32>
    %254 = tpu.concatenate %231, %253 in 1 : vector<10x16xf32>, vector<10x16xf32> -> vector<10x32xf32>
    %255 = arith.truncf %254 : vector<10x32xf32> to vector<10x32xbf16>
    %c1_90 = arith.constant 1 : index
    %c0_91 = arith.constant 0 : index
    %c0_92 = arith.constant 0 : index
    %256 = vector.load %arg6[%c1_90, %c0_91, %c0_92] : memref<2x32x32xbf16, #tpu.memory_space<vmem>>, vector<1x32x32xbf16>
    %257 = vector.shape_cast %256 : vector<1x32x32xbf16> to vector<32x32xbf16>
    %cst_93 = arith.constant dense<0.000000e+00> : vector<10x32xf32>
    %258 = tpu.matmul %255, %257, %cst_93 {dimension_numbers = #tpu.dot_dimension_numbers<[1], [0], [0], [1], [0, 0, 1, 1], [], []>} : vector<10x32xbf16>, vector<32x32xbf16>, vector<10x32xf32> -> vector<10x32xf32>
    %259 = arith.addf %171, %258 : vector<10x32xf32>
    %260 = vector.broadcast %178 : vector<1x32xf32> to vector<10x32xf32>
    %261 = arith.addf %259, %260 : vector<10x32xf32>
    %cst_94 = arith.constant dense<0.000000e+00> : vector<10xf32>
    %262 = vector.multi_reduction <add>, %261, %cst_94 [1] : vector<10x32xf32> to vector<10xf32>
    %263 = vector.shape_cast %262 : vector<10xf32> to vector<10x1xf32>
    %cst_95 = arith.constant 3.200000e+01 : f32
    %264 = vector.broadcast %cst_95 : f32 to vector<10x1xf32>
    %265 = arith.divf %263, %264 : vector<10x1xf32>
    %266 = vector.broadcast %265 : vector<10x1xf32> to vector<10x32xf32>
    %267 = arith.subf %261, %266 : vector<10x32xf32>
    %268 = arith.mulf %267, %267 : vector<10x32xf32>
    %cst_96 = arith.constant dense<0.000000e+00> : vector<10xf32>
    %269 = vector.multi_reduction <add>, %268, %cst_96 [1] : vector<10x32xf32> to vector<10xf32>
    %270 = vector.shape_cast %269 : vector<10xf32> to vector<10x1xf32>
    %cst_97 = arith.constant 3.200000e+01 : f32
    %271 = vector.broadcast %cst_97 : f32 to vector<10x1xf32>
    %272 = arith.divf %270, %271 : vector<10x1xf32>
    %273 = vector.broadcast %265 : vector<10x1xf32> to vector<10x32xf32>
    %274 = arith.subf %261, %273 : vector<10x32xf32>
    %cst_98 = arith.constant 9.99999997E-7 : f32
    %275 = vector.broadcast %cst_98 : f32 to vector<10x1xf32>
    %276 = arith.addf %272, %275 : vector<10x1xf32>
    %277 = math.rsqrt %276 : vector<10x1xf32>
    %278 = vector.broadcast %277 : vector<10x1xf32> to vector<10x32xf32>
    %279 = arith.mulf %274, %278 : vector<10x32xf32>
    %280 = vector.broadcast %176 : vector<1x32xf32> to vector<10x32xf32>
    %281 = arith.mulf %279, %280 : vector<10x32xf32>
    %282 = vector.broadcast %177 : vector<1x32xf32> to vector<10x32xf32>
    %283 = arith.addf %281, %282 : vector<10x32xf32>
    %284 = arith.truncf %283 : vector<10x32xf32> to vector<10x32xbf16>
    %c1_99 = arith.constant 1 : index
    %c0_100 = arith.constant 0 : index
    %c0_101 = arith.constant 0 : index
    %285 = vector.load %arg7[%c1_99, %c0_100, %c0_101] : memref<2x32x128xbf16, #tpu.memory_space<vmem>>, vector<1x32x128xbf16>
    %286 = vector.shape_cast %285 : vector<1x32x128xbf16> to vector<32x128xbf16>
    %cst_102 = arith.constant dense<0.000000e+00> : vector<10x128xf32>
    %287 = tpu.matmul %284, %286, %cst_102 {dimension_numbers = #tpu.dot_dimension_numbers<[1], [0], [0], [1], [0, 0, 1, 1], [], []>} : vector<10x32xbf16>, vector<32x128xbf16>, vector<10x128xf32> -> vector<10x128xf32>
    %c1_103 = arith.constant 1 : index
    %c0_104 = arith.constant 0 : index
    %c0_105 = arith.constant 0 : index
    %288 = vector.load %arg8[%c1_103, %c0_104, %c0_105] : memref<2x1x128xf32, #tpu.memory_space<vmem>>, vector<1x1x128xf32>
    %289 = vector.shape_cast %288 : vector<1x1x128xf32> to vector<1x128xf32>
    %290 = vector.broadcast %289 : vector<1x128xf32> to vector<10x128xf32>
    %291 = arith.addf %287, %290 : vector<10x128xf32>
    %cst_106 = arith.constant 5.000000e-01 : f32
    %292 = vector.broadcast %cst_106 : f32 to vector<10x128xf32>
    %293 = arith.mulf %292, %291 : vector<10x128xf32>
    %cst_107 = arith.constant 0.707106769 : f32
    %294 = vector.broadcast %cst_107 : f32 to vector<10x128xf32>
    %295 = arith.mulf %291, %294 : vector<10x128xf32>
    %296 = math.absf %295 : vector<10x128xf32>
    %cst_108 = arith.constant 0.327591091 : f32
    %297 = vector.broadcast %cst_108 : f32 to vector<10x128xf32>
    %298 = arith.mulf %297, %296 : vector<10x128xf32>
    %cst_109 = arith.constant 1.000000e+00 : f32
    %299 = vector.broadcast %cst_109 : f32 to vector<10x128xf32>
    %300 = arith.addf %299, %298 : vector<10x128xf32>
    %301 = tpu.reciprocal %300 {approx = true} : vector<10x128xf32> -> vector<10x128xf32>
    %cst_110 = arith.constant 1.06140542 : f32
    %302 = vector.broadcast %cst_110 : f32 to vector<10x128xf32>
    %303 = arith.mulf %301, %302 : vector<10x128xf32>
    %cst_111 = arith.constant -1.45315206 : f32
    %304 = vector.broadcast %cst_111 : f32 to vector<10x128xf32>
    %305 = arith.addf %304, %303 : vector<10x128xf32>
    %306 = arith.mulf %301, %305 : vector<10x128xf32>
    %cst_112 = arith.constant 1.42141378 : f32
    %307 = vector.broadcast %cst_112 : f32 to vector<10x128xf32>
    %308 = arith.addf %307, %306 : vector<10x128xf32>
    %309 = arith.mulf %301, %308 : vector<10x128xf32>
    %cst_113 = arith.constant -0.284496725 : f32
    %310 = vector.broadcast %cst_113 : f32 to vector<10x128xf32>
    %311 = arith.addf %310, %309 : vector<10x128xf32>
    %312 = arith.mulf %301, %311 : vector<10x128xf32>
    %cst_114 = arith.constant 0.254829586 : f32
    %313 = vector.broadcast %cst_114 : f32 to vector<10x128xf32>
    %314 = arith.addf %313, %312 : vector<10x128xf32>
    %315 = arith.mulf %301, %314 : vector<10x128xf32>
    %cst_115 = arith.constant 0.000000e+00 : f32
    %316 = vector.broadcast %cst_115 : f32 to vector<10x128xf32>
    %317 = arith.subf %316, %296 : vector<10x128xf32>
    %318 = arith.mulf %317, %296 : vector<10x128xf32>
    %319 = math.exp %318 : vector<10x128xf32>
    %320 = arith.mulf %315, %319 : vector<10x128xf32>
    %cst_116 = arith.constant 1.000000e+00 : f32
    %321 = vector.broadcast %cst_116 : f32 to vector<10x128xf32>
    %322 = arith.subf %321, %320 : vector<10x128xf32>
    %cst_117 = arith.constant 0.000000e+00 : f32
    %323 = vector.broadcast %cst_117 : f32 to vector<10x128xf32>
    %324 = arith.cmpf oge, %295, %323 : vector<10x128xf32>
    %cst_118 = arith.constant 0.000000e+00 : f32
    %325 = vector.broadcast %cst_118 : f32 to vector<10x128xf32>
    %326 = arith.subf %325, %322 : vector<10x128xf32>
    %327 = arith.select %324, %322, %326 : vector<10x128xi1>, vector<10x128xf32>
    %cst_119 = arith.constant 1.000000e+00 : f32
    %328 = vector.broadcast %cst_119 : f32 to vector<10x128xf32>
    %329 = arith.addf %328, %327 : vector<10x128xf32>
    %330 = arith.mulf %293, %329 : vector<10x128xf32>
    %331 = arith.truncf %330 : vector<10x128xf32> to vector<10x128xbf16>
    %c1_120 = arith.constant 1 : index
    %c0_121 = arith.constant 0 : index
    %c0_122 = arith.constant 0 : index
    %332 = vector.load %arg9[%c1_120, %c0_121, %c0_122] : memref<2x128x32xbf16, #tpu.memory_space<vmem>>, vector<1x128x32xbf16>
    %333 = vector.shape_cast %332 : vector<1x128x32xbf16> to vector<128x32xbf16>
    %cst_123 = arith.constant dense<0.000000e+00> : vector<10x32xf32>
    %334 = tpu.matmul %331, %333, %cst_123 {dimension_numbers = #tpu.dot_dimension_numbers<[1], [0], [0], [1], [0, 0, 1, 1], [], []>} : vector<10x128xbf16>, vector<128x32xbf16>, vector<10x32xf32> -> vector<10x32xf32>
    %335 = arith.addf %261, %334 : vector<10x32xf32>
    %336 = vector.broadcast %179 : vector<1x32xf32> to vector<10x32xf32>
    %337 = arith.addf %335, %336 : vector<10x32xf32>
    %c0_124 = arith.constant 0 : index
    %c0_125 = arith.constant 0 : index
    %338 = vector.load %arg11[%c0_124, %c0_125] : memref<2x32xf32, #tpu.memory_space<vmem>>, vector<2x32xf32>
    %339 = vector.extract_strided_slice %338 {offsets = [0, 0], sizes = [1, 32], strides = [1, 1]} : vector<2x32xf32> to vector<1x32xf32>
    %340 = vector.extract_strided_slice %338 {offsets = [1, 0], sizes = [1, 32], strides = [1, 1]} : vector<2x32xf32> to vector<1x32xf32>
    %cst_126 = arith.constant dense<0.000000e+00> : vector<10xf32>
    %341 = vector.multi_reduction <add>, %337, %cst_126 [1] : vector<10x32xf32> to vector<10xf32>
    %342 = vector.shape_cast %341 : vector<10xf32> to vector<10x1xf32>
    %cst_127 = arith.constant 3.200000e+01 : f32
    %343 = vector.broadcast %cst_127 : f32 to vector<10x1xf32>
    %344 = arith.divf %342, %343 : vector<10x1xf32>
    %345 = vector.broadcast %344 : vector<10x1xf32> to vector<10x32xf32>
    %346 = arith.subf %337, %345 : vector<10x32xf32>
    %347 = arith.mulf %346, %346 : vector<10x32xf32>
    %cst_128 = arith.constant dense<0.000000e+00> : vector<10xf32>
    %348 = vector.multi_reduction <add>, %347, %cst_128 [1] : vector<10x32xf32> to vector<10xf32>
    %349 = vector.shape_cast %348 : vector<10xf32> to vector<10x1xf32>
    %cst_129 = arith.constant 3.200000e+01 : f32
    %350 = vector.broadcast %cst_129 : f32 to vector<10x1xf32>
    %351 = arith.divf %349, %350 : vector<10x1xf32>
    %352 = vector.broadcast %344 : vector<10x1xf32> to vector<10x32xf32>
    %353 = arith.subf %337, %352 : vector<10x32xf32>
    %cst_130 = arith.constant 9.99999997E-7 : f32
    %354 = vector.broadcast %cst_130 : f32 to vector<10x1xf32>
    %355 = arith.addf %351, %354 : vector<10x1xf32>
    %356 = math.rsqrt %355 : vector<10x1xf32>
    %357 = vector.broadcast %356 : vector<10x1xf32> to vector<10x32xf32>
    %358 = arith.mulf %353, %357 : vector<10x32xf32>
    %359 = vector.broadcast %339 : vector<1x32xf32> to vector<10x32xf32>
    %360 = arith.mulf %358, %359 : vector<10x32xf32>
    %361 = vector.broadcast %340 : vector<1x32xf32> to vector<10x32xf32>
    %362 = arith.addf %360, %361 : vector<10x32xf32>
    %c0_131 = arith.constant 0 : index
    %c0_132 = arith.constant 0 : index
    %363 = vector.load %arg12[%c0_131, %c0_132] : memref<10x32xf32, #tpu.memory_space<vmem>>, vector<10x32xf32>
    tpu.vector_store %arg12[%c0_131, %c0_132], %362 {strides = array<i32>} : memref<10x32xf32, #tpu.memory_space<vmem>>, vector<10x32xf32>,
    return
  }
}

</mosaic_0001>

<bundles_post_ra>
// kernel: vit_forward.1
= control target key start
LH: loop header
LB: loop body
LE: loop exit
PB: predicated region body
PF: predicated region fallthrough
CT: control target
= control target key end

     0   :  { %vm590_vm0 = vcmask 261120   ;;  %vm594_vm1 = vcmask 254976   ;;  %vm2629_vm2 = vmmov 0   ;;  %s2630_s30 = smov 96   ;;  %s2631_s13 = smov 80   ;;  %vm703_vm3 = vcmask 130048   ;;  %s3257_s1 = inlined_call_operand.vmem [shape: bf16[768,32], index: 1, kind: input, shape index: {}]   ;;  %s3258_s0 = inlined_call_operand.vmem [shape: bf16[10,768], index: 0, kind: input, shape index: {}]   ;;  %s3259_s2 = inlined_call_operand.vmem [shape: f32[10,32], index: 2, kind: input, shape index: {}]   ;;  %s3260_s4 = inlined_call_operand.vmem [shape: bf16[2,32,96], index: 4, kind: input, shape index: {}]   ;;  %s3261_s10 = inlined_call_operand.vmem [shape: f32[2,6,32], index: 10, kind: input, shape index: {}]   ;;  %s3262_s5 = inlined_call_operand.vmem [shape: f32[2,1,96], index: 5, kind: input, shape index: {}]   ;;  %s3263_s3 = inlined_call_operand.vmem [shape: f32[10,10], index: 3, kind: input, shape index: {}]   ;;  %s3264_s6 = inlined_call_operand.vmem [shape: bf16[2,32,32], index: 6, kind: input, shape index: {}]   ;;  %s3265_s7 = inlined_call_operand.vmem [shape: bf16[2,32,128], index: 7, kind: input, shape index: {}]   ;;  %s3266_s9 = inlined_call_operand.vmem [shape: bf16[2,128,32], index: 9, kind: input, shape index: {}]   ;;  %s3267_s8 = inlined_call_operand.vmem [shape: f32[2,1,128], index: 8, kind: input, shape index: {}]   ;;  %s3268_s11 = inlined_call_operand.vmem [shape: f32[2,32], index: 11, kind: input, shape index: {}]   ;;  %s3269_s12 = inlined_call_operand.vmem [shape: f32[10,32], index: 12, kind: output, shape index: {}]  }
   0x1   :  { %v2475_v0 = vld [vmem:[%s3257_s1 + $0x78] sm:$0xff]   ;;  %v2479_v4 = vld [vmem:[%s3257_s1 + $0x70] sm:$0xff]   ;;  %v2483_v8 = vld [vmem:[%s3257_s1 + $0x68] sm:$0xff]   ;;  %s2632_s14 = smov 112   ;;  %vm755_vm4 = vcmask 80896   ;;  %vm759_vm5 = vcmask 74752  }
   0x2   :  { %v2476_v1 = vld [vmem:[%s3257_s1 + $0x38] sm:$0xff]   ;;  %2203 = vmatprep.subr.bf16.mxu0 %v2475_v0  ;;  %v2480_v5 = vld [vmem:[%s3257_s1 + $0x30] sm:$0xff]   ;;  %v2484_v9 = vld [vmem:[%s3257_s1 + $0x28] sm:$0xff]   ;;  %vm785_vm6 = vcmask 1044480   ;;  %s2634_s19 = smov 48   ;;  %s2635_s23 = smov 16  }
   0x3   :  { %v2477_v2 = vld [vmem:[%s3257_s1 + $0xf8] sm:$0xff]   ;;  %2204 = vmatpush3.bf16.msra.mxu0 %v2476_v1  ;;  %v2481_v6 = vld [vmem:[%s3257_s1 + $0xf0] sm:$0xff]   ;;  %v2485_v10 = vld [vmem:[%s3257_s1 + $0xe8] sm:$0xff]  }
   0x4   :  { %v2478_v3 = vld [vmem:[%s3257_s1 + $0xb8] sm:$0xff]   ;;  %2225 = vmatprep.subr.bf16.mxu1 %v2477_v2  ;;  %2205 = vmatprep.subr.bf16.mxu0 %v2479_v4  ;;  %v2482_v7 = vld [vmem:[%s3257_s1 + $0xb0] sm:$0xff]   ;;  %v2486_v11 = vld [vmem:[%s3257_s1 + $0xa8] sm:$0xff]  }
   0x5   :  { %2226 = vmatpush3.bf16.msra.mxu1 %v2478_v3  ;;  %v2487_v12 = vld [vmem:[%s3257_s1 + $0x60] sm:$0xff]   ;;  %v2491_v16 = vld [vmem:[%s3257_s1 + $0x58] sm:$0xff]   ;;  %v2495_v20 = vld [vmem:[%s3257_s1 + $0x50] sm:$0xff]  }
   0x6   :  { %2227 = vmatprep.subr.bf16.mxu1 %v2481_v6  ;;  %v2488_v13 = vld [vmem:[%s3257_s1 + $0x20] sm:$0xff]   ;;  %v2492_v17 = vld [vmem:[%s3257_s1 + $0x18] sm:$0xff]   ;;  %v2496_v21 = vld [vmem:[%s3257_s1 + $0x10] sm:$0xff]  }
   0x7   :  { %2206 = vmatpush3.bf16.msra.mxu0 %v2480_v5  ;;  %v2489_v14 = vld [vmem:[%s3257_s1 + $0xe0] sm:$0xff]   ;;  %v2493_v18 = vld [vmem:[%s3257_s1 + $0xd8] sm:$0xff]   ;;  %v2497_v22 = vld [vmem:[%s3257_s1 + $0xd0] sm:$0xff]  }
   0x8   :  { %2207 = vmatprep.subr.bf16.mxu0 %v2483_v8  ;;  %v2490_v15 = vld [vmem:[%s3257_s1 + $0xa0] sm:$0xff]   ;;  %v2494_v19 = vld [vmem:[%s3257_s1 + $0x98] sm:$0xff]   ;;  %v2498_v23 = vld [vmem:[%s3257_s1 + $0x90] sm:$0xff]  }
   0x9   :  { %2228 = vmatpush3.bf16.msra.mxu1 %v2482_v7  ;;  %v2499_v24 = vld [vmem:[%s3257_s1 + $0x48] sm:$0xff]   ;;  %v2503_v28 = vld [vmem:[%s3257_s1 + $0x40] sm:$0xff]   ;;  %v2510_v34 = vld [vmem:[%s3257_s1 + $0x178] sm:$0xff]  }
   0xa   :  { %2229 = vmatprep.subr.bf16.mxu1 %v2485_v10  ;;  %v2500_v25 = vld [vmem:[%s3257_s1 + $0x8] sm:$0xff]   ;;  %v2504_v29 = vld [vmem:[%s3257_s1] sm:$0xff]   ;;  %v2514_v37 = vld [vmem:[%s3257_s1 + $0x138] sm:$0xff]  }
   0xb   :  { %2208 = vmatpush3.bf16.msra.mxu0 %v2484_v9  ;;  %v2501_v26 = vld [vmem:[%s3257_s1 + $0xc8] sm:$0xff]   ;;  %v2505_v30 = vld [vmem:[%s3257_s1 + $0xc0] sm:$0xff]   ;;  %v2515_v38 = vld [vmem:[%s3257_s1 + $0x170] sm:$0xff]  }
   0xc   :  { %2209 = vmatprep.subr.bf16.mxu0 %v2487_v12  ;;  %v2502_v27 = vld [vmem:[%s3257_s1 + $0x88] sm:$0xff]   ;;  %v2506_v31 = vld [vmem:[%s3258_s0] ss:$24 sps:$4 sm:$0x1f]   ;;  %v2516_v39 = vld [vmem:[%s3257_s1 + $0x130] sm:$0xff]  }
   0xd   :  { %2230 = vmatpush3.bf16.msra.mxu1 %v2486_v11  ;;  %v2508_v32 = vld [vmem:[%s3258_s0 + $0x4] ss:$24 sps:$4 sm:$0x1f]   ;;  %v2511_v35 = vld [vmem:[%s3258_s0 + $0x8] ss:$24 sps:$4 sm:$0x1f]  }
   0xe   :  { %2231 = vmatprep.subr.bf16.mxu1 %v2489_v14  ;;  %v2509_v33 = vld [vmem:[%s3257_s1 + $0x80] sm:$0xff]   ;;  %496 = vmatprep.mubr.bf16.mxu0 %v2508_v32  ;;  %v2517_v40 = vld [vmem:[%s3257_s1 + $0x168] sm:$0xff]   ;;  %v2521_v44 = vld [vmem:[%s3257_s1 + $0x158] sm:$0xff]  }
   0xf   :  { %2210 = vmatpush3.bf16.msra.mxu0 %v2488_v13  ;;  %v2513_v36 = vld [vmem:[%s3258_s0 + $0xc] ss:$24 sps:$4 sm:$0x1f]   ;;  %v2522_v45 = vld [vmem:[%s3257_s1 + $0x118] sm:$0xff]   ;;  %v2523_v46 = vld [vmem:[%s3257_s1 + $0x150] sm:$0xff]  }
  0x10   :  { %2211 = vmatprep.subr.bf16.mxu0 %v2491_v16  ;;  %537 = vmatprep.mubr.bf16.mxu1 %v2513_v36  ;;  %v2518_v41 = vld [vmem:[%s3257_s1 + $0x128] sm:$0xff]   ;;  %v2519_v42 = vld [vmem:[%s3257_s1 + $0x160] sm:$0xff]   ;;  %v2524_v48 = vld [vmem:[%s3257_s1 + $0x110] sm:$0xff]  }
  0x11   :  { %2232 = vmatpush3.bf16.msra.mxu1 %v2490_v15  ;;  %v2520_v43 = vld [vmem:[%s3257_s1 + $0x120] sm:$0xff]   ;;  %v2531_v47 = vld [vmem:[%s3258_s0 + $0x14] ss:$24 sps:$4 sm:$0x1f]   ;;  %v145_v2 = vld [vmem:[%s3259_s2 + $0x8] sm:$0x3] }
  0x12   :  { %2233 = vmatprep.subr.bf16.mxu1 %v2493_v18  ;;  %v2525_v49 = vld [vmem:[%s3257_s1 + $0x148] sm:$0xff]   ;;  %v2527_v51 = vld [vmem:[%s3257_s1 + $0x140] sm:$0xff]  }
  0x13   :  { %2212 = vmatpush3.bf16.msra.mxu0 %v2492_v17  ;;  %v2526_v50 = vld [vmem:[%s3257_s1 + $0x108] sm:$0xff]   ;;  %v2528_v52 = vld [vmem:[%s3257_s1 + $0x100] sm:$0xff]  }
  0x14   :  { %2213 = vmatprep.subr.bf16.mxu0 %v2495_v20  ;;  %v2529_v53 = vld [vmem:[%s3258_s0 + $0x10] ss:$24 sps:$4 sm:$0x1f]   ;;  %v144_v60 = vld [vmem:[%s3259_s2] sm:$0xff] }
  0x15   :  { %2234 = vmatpush3.bf16.msra.mxu1 %v2494_v19 }
  0x16   :  { %2235 = vmatprep.subr.bf16.mxu1 %v2497_v22 }
  0x17   :  { %2214 = vmatpush3.bf16.msra.mxu0 %v2496_v21 }
  0x18   :  { %2215 = vmatprep.subr.bf16.mxu0 %v2499_v24 }
  0x19   :  { %2236 = vmatpush3.bf16.msra.mxu1 %v2498_v23 }
  0x1a   :  { %2237 = vmatprep.subr.bf16.mxu1 %v2501_v26 }
  0x1b   :  { %2216 = vmatpush3.bf16.msra.mxu0 %v2500_v25 }
  0x1c   :  { %2217 = vmatprep.subr.bf16.mxu0 %v2503_v28  ;;  %v2532_v28 = vld [vmem:[%s3260_s4 + $0x8] sm:$0xff]  }
  0x1d   :  { %2238 = vmatpush3.bf16.msra.mxu1 %v2502_v27 }
  0x1e   :  { %2239 = vmatprep.subr.bf16.mxu1 %v2505_v30  ;;  %v2533_v30 = vld [vmem:[%s3260_s4] sm:$0xff]  }
  0x1f   :  { %2218 = vmatpush3.bf16.msra.mxu0 %v2504_v29  ;;  %v2628_v29 = vmov 0.0  }
  0x20   :  { %2247 = vmatprep.subr.bf16.mxu0 %v2510_v34 }
  0x21   :  { %2240 = vmatpush3.bf16.msra.mxu1 %v2509_v33 }
  0x22   :  { %497 = vmatmul.mubr.bf16.vlgmr.msra.gmra.mxu0 %v2506_v31  ;;  %2321 = vmatprep.subr.bf16.mxu1 %v2628_v29 }
  0x23   :  { %2248 = vmatpush3.bf16.msra.mxu0 %v2514_v37  ;;  %578 = vmatprep.mubr.bf16.mxu0 %v2531_v47  ;;  %v619_v37 = vlaneseq }
  0x24   :  { %538 = vmatmul.mubr.bf16.vlgmr.msra.gmra.mxu1 %v2511_v35  ;;  %2249 = vmatprep.subr.bf16.mxu0 %v2515_v38 }
  0x25   :  { %2322 = vmatpush3.bf16.msra.mxu1 %v2532_v28  ;;  %2325 = vmatprep.mubr.msk.bf16.mxu1 %vm2629_vm2, %v2628_v29  ;;  %v2895_v38 = vshrl.u32 %v619_v37, 7 }
  0x26   :  { %2323 = vmatprep.subr.bf16.mxu1 %v2628_v29 }
  0x27   :  { %2250 = vmatpush3.bf16.msra.mxu0 %v2516_v39  ;;  %v2898_v39 = vsub.s32 0, %v2895_v38 }
  0x28   :  { %2251 = vmatprep.subr.bf16.mxu0 %v2517_v40  ;;  %v2903_v40 = vld [vmem:[%s3261_s10] sm:$0x3f] }
  0x29   :  { %2324 = vmatpush3.bf16.msra.mxu1 %v2533_v30 }
  0x2a   :  { %2329 = vmatprep.subr.bf16.mxu1 %v2628_v29 }
  0x2b   :  { %2252 = vmatpush3.bf16.msra.mxu0 %v2518_v41 }
  0x2c   :  { %2253 = vmatprep.subr.bf16.mxu0 %v2519_v42 }
  0x2f   :  { %2254 = vmatpush3.bf16.msra.mxu0 %v2520_v43  ;;  %v622_v43 = vrot.slane %v2903_v40, %v2898_v39 }
  0x30   :  { %2255 = vmatprep.subr.bf16.mxu0 %v2521_v44  ;;  %v2908_v44 = vsub.s32 1, %v2895_v38 }
  0x33   :  { %2256 = vmatpush3.bf16.msra.mxu0 %v2522_v45 }
  0x34   :  { %2257 = vmatprep.subr.bf16.mxu0 %v2523_v46 }
  0x37   :  { %2258 = vmatpush3.bf16.msra.mxu0 %v2524_v48  ;;  %v628_v48 = vrot.slane %v2903_v40, %v2908_v44 }
  0x38   :  { %2259 = vmatprep.subr.bf16.mxu0 %v2525_v49 }
  0x3b   :  { %2260 = vmatpush3.bf16.msra.mxu0 %v2526_v50 }
  0x3c   :  { %2261 = vmatprep.subr.bf16.mxu0 %v2527_v51 }
  0x3f   :  { %2262 = vmatpush3.bf16.msra.mxu0 %v2528_v52 }
  0x40   :  { %2389 = vmatprep.subr.bf16.mxu0 %v2628_v29 }
  0x42   :  { %579 = vmatmul.mubr.bf16.vlgmr.msra.gmra.mxu0 %v2529_v53 }
  0x43   :  { %2393 = vmatprep.mubr.msk.bf16.mxu0 %vm2629_vm2, %v2628_v29 }
  0xe2   :  { %v2219_v54 = vpop.f32.mrf.mxu0 }
  0xe4   :  { %v2220_v55 = vpop.f32.mrf.mxu0  ;;  %v2241_v56 = vpop.f32.mrf.mxu1 }
  0xe5   :  { %v2221_v59 = vadd.f32 %v2220_v55, %v2219_v54  ;;  %v2126_v54 = vld [vmem:[%s3262_s5] ss:$0 sm:$0xff] }
  0xe6   :  { %v2222_v57 = vpop.f32.mrf.mxu0  ;;  %v2242_v58 = vpop.f32.mrf.mxu1 }
  0xe7   :  { %v499_v63 = vadd.f32 %v2221_v59, %v144_v60  ;;  %v2243_v0 = vadd.f32 %v2242_v58, %v2241_v56 }
  0xe8   :  { %v2223_v61 = vpop.f32.mrf.mxu0  ;;  %v2244_v62 = vpop.f32.mrf.mxu1 }
  0xe9   :  { %v2224_v1 = vadd.f32 %v2223_v61, %v2222_v57  ;;  %v540_v6 = vadd.f32 %v2243_v0, %v499_v63  ;;  %v2935_v0 = vld [vmem:[%s3263_s3] sm:$0xff] }
  0xea   :  { %v2245_v3 = vpop.f32.mrf.mxu1 }
  0xeb   :  { %v502_v7 = vadd.f32 %v2224_v1, %v145_v2  ;;  %v2246_v8 = vadd.f32 %v2245_v3, %v2244_v62 }
  0xed   :  { %v543_v13 = vadd.f32 %v2246_v8, %v502_v7 }
 0x102   :  { %v2263_v4 = vpop.f32.mrf.mxu0 }
 0x104   :  { %v2264_v5 = vpop.f32.mrf.mxu0 }
 0x105   :  { %v2265_v9 = vadd.f32 %v2264_v5, %v2263_v4  ;;  %v2941_v5 = vld [vmem:[%s3263_s3 + $0x8] sm:$0x3]  ;;  %s2633_s3 = smov 64  }
 0x106   :  { %v2266_v10 = vpop.f32.mrf.mxu0 }
 0x107   :  { %v2869_v11 = vadd.f32 %v2265_v9, %v540_v6 }
 0x108   :  { %v2267_v12 = vpop.f32.mrf.mxu0 }
 0x109   :  { %v2268_v14 = vadd.f32 %v2267_v12, %v2266_v10  ;;  %v591_v15 = vsel %vm590_vm0, %v2869_v11, 0.0 }
 0x10a   :  { %592 = vadd.xlane.f32.xlu0 %v591_v15 }
 0x10b   :  { %v2873_v16 = vadd.f32 %v2268_v14, %v543_v13 }
 0x10d   :  { %v595_v17 = vsel %vm594_vm1, %v2873_v16, 0.0 }
 0x10e   :  { %596 = vadd.xlane.f32.xlu0 %v595_v17 }
 0x193   :  { %v593_v18 = vpop.xlane.xlu0 %592 }
 0x194   :  { %v599_v19 = vmul.f32 0.03125, %v593_v18 }
 0x196   :  { %v601_v20 = vsub.f32 %v2869_v11, %v599_v19 }
 0x197   :  { %v597_v21 = vpop.xlane.xlu0 %596 }
 0x198   :  { %v600_v22 = vmul.f32 0.03125, %v597_v21  ;;  %v603_v23 = vmul.f32 %v601_v20, %v601_v20 }
 0x19a   :  { %v602_v24 = vsub.f32 %v2873_v16, %v600_v22  ;;  %v605_v25 = vsel %vm590_vm0, %v603_v23, 0.0 }
 0x19b   :  { %606 = vadd.xlane.f32.xlu1 %v605_v25 }
 0x19c   :  { %v604_v26 = vmul.f32 %v602_v24, %v602_v24 }
 0x19e   :  { %v608_v27 = vsel %vm594_vm1, %v604_v26, 0.0 }
 0x19f   :  { %609 = vadd.xlane.f32.xlu1 %v608_v27 }
 0x224   :  { %v607_v31 = vpop.xlane.xlu1 %606 }
 0x225   :  { %v611_v32 = vmul.f32 0.03125, %v607_v31 }
 0x227   :  { %v613_v33 = vadd.f32 1e-06, %v611_v32 }
 0x228   :  { %v610_v34 = vpop.xlane.xlu1 %609 }
 0x229   :  { %2560 = vrsqrt.f32 %v613_v33  ;;  %v612_v35 = vmul.f32 0.03125, %v610_v34 }
 0x22b   :  { %v614_v36 = vadd.f32 1e-06, %v612_v35 }
 0x22d   :  { %2562 = vrsqrt.f32 %v614_v36 }
 0x236   :  { %v2561_v41 = vpop.eup %2560 }
 0x237   :  { %v617_v42 = vmul.f32 %v2561_v41, %v601_v20 }
 0x239   :  { %v623_v47 = vmul.f32 %v622_v43, %v617_v42 }
 0x23a   :  { %v2563_v45 = vpop.eup %2562 }
 0x23b   :  { %v618_v46 = vmul.f32 %v2563_v45, %v602_v24  ;;  %v629_v50 = vadd.f32 %v628_v48, %v623_v47 }
 0x23d   :  { %v624_v49 = vmul.f32 %v622_v43, %v618_v46 }
 0x23f   :  { %v630_v51 = vadd.f32 %v628_v48, %v624_v49 }
 0x241   :  { %v631_v52 = vpack.c.bf16 %v630_v51, %v629_v50 }
 0x243   :  { %2326 = vmatmul.mubr.msk.bf16.vlgmr.msra.gmra.mxu1 %vm590_vm0, %v631_v52 }
 0x244   :  { %2331 = vmatprep.mubr.msk.bf16.mxu1 %vm2629_vm2, %v2628_v29 }
 0x303   :  { %v692_v53 = vpop.f32.mrf.mxu1 }
 0x304   :  { %v693_v57 = vadd.f32 %v2126_v54, %v692_v53 }
 0x305   :  { %v2327_v55 = vpop.f32.mrf.mxu1 }
 0x307   :  { %v695_v56 = vpop.f32.mrf.mxu1 }
 0x308   :  { %v696_v58 = vadd.f32 %v2126_v54, %v695_v56 }
 0x309   :  { %v2328_v59 = vpop.f32.mrf.mxu1 }
 0x30a   :  { %v2918_v60 = vpack.c.bf16 %v696_v58, %v693_v57 }
 0x30c   :  { %701 = vrot.lane.b32.xlu0 %v2918_v60, %s2630_s30 }
 0x310   :  { %832 = vrot.lane.b32.xlu0 %v2918_v60, %s2631_s13 }
 0x314   :  { %830 = vrot.lane.b32.xlu0 %v2918_v60, %s2632_s14 }
 0x37e   :  { %v702_v61 = vpop.permute.xlu0 %701 }
 0x37f   :  { %v708_v62 = vsel %vm703_vm3, %v702_v61, 0 }
 0x380   :  { %2330 = vmatpush3.bf16.xpose.msra.mxu1 %v708_v62 }
 0x381   :  { %2335 = vmatprep.subr.bf16.mxu1 %v2628_v29 }
 0x382   :  { %v833_v32 = vpop.permute.xlu0 %832 }
 0x383   :  { %v838_v34 = vsel %vm703_vm3, %v833_v32, 0 }
 0x386   :  { %v831_v35 = vpop.permute.xlu0 %830 }
 0x387   :  { %2332 = vmatmul.mubr.msk.bf16.vlgmr.msra.gmra.mxu1 %vm703_vm3, %v2918_v60 }
 0x388   :  { %2337 = vmatprep.mubr.msk.bf16.mxu1 %vm2629_vm2, %v2628_v29 }
 0x447   :  { %v744_v63 = vpop.f32.mrf.mxu1 }
 0x448   :  { %v751_v1 = vmul.f32 0.25, %v744_v63 }
 0x449   :  { %v2333_v2 = vpop.f32.mrf.mxu1 }
 0x44a   :  { %v753_v3 = vadd.f32 %v751_v1, %v2935_v0 }
 0x44b   :  { %v747_v4 = vpop.f32.mrf.mxu1 }
 0x44c   :  { %v752_v6 = vmul.f32 0.25, %v747_v4  ;;  %v756_v7 = vsel %vm755_vm4, %v753_v3, -inf }
 0x44d   :  { %757 = vmax.xlane.f32.xlu1 %v756_v7  ;;  %v2334_v8 = vpop.f32.mrf.mxu1 }
 0x44e   :  { %v754_v9 = vadd.f32 %v752_v6, %v2941_v5 }
 0x450   :  { %v760_v10 = vsel %vm759_vm5, %v754_v9, -inf }
 0x451   :  { %761 = vmax.xlane.f32.xlu1 %v760_v10 }
 0x4d6   :  { %v758_v12 = vpop.xlane.xlu1 %757 }
 0x4d7   :  { %v763_v13 = vsub.f32 %v753_v3, %v758_v12 }
 0x4d9   :  { %v765_v14 = vmul.f32 1.442695, %v763_v13  ;;  %v2535_v13 = vld [vmem:[%s3264_s6] sm:$0xff]  }
 0x4da   :  { %v762_v15 = vpop.xlane.xlu1 %761 }
 0x4db   :  { %2564 = vpow2.f32 %v765_v14  ;;  %v764_v17 = vsub.f32 %v754_v9, %v762_v15 }
 0x4dd   :  { %v767_v18 = vmul.f32 1.442695, %v764_v17 }
 0x4df   :  { %2566 = vpow2.f32 %v767_v18 }
 0x4e8   :  { %v2565_v19 = vpop.eup %2564 }
 0x4e9   :  { %v769_v20 = vsel %vm755_vm4, %v2565_v19, 0.0 }
 0x4ea   :  { %770 = vadd.xlane.f32.xlu1 %v769_v20 }
 0x4ec   :  { %v2567_v21 = vpop.eup %2566 }
 0x4ed   :  { %v772_v22 = vsel %vm759_vm5, %v2567_v21, 0.0 }
 0x4ee   :  { %773 = vadd.xlane.f32.xlu1 %v772_v22 }
 0x4ff   :  { %780 = vrot.lane.b32.xlu1 %v2918_v60, %s2633_s3 }
 0x573   :  { %v771_v23 = vpop.xlane.xlu1 %770 }
 0x574   :  { %2568 = vrcp.f32 %v771_v23 }
 0x577   :  { %v774_v24 = vpop.xlane.xlu1 %773 }
 0x578   :  { %2570 = vrcp.f32 %v774_v24 }
 0x57b   :  { %v781_v25 = vpop.permute.xlu1 %780 }
 0x57c   :  { %v787_v26 = vsel %vm785_vm6, %v781_v25, 0 }
 0x57d   :  { %2336 = vmatpush3.bf16.msra.mxu1 %v787_v26  ;;  %v1032_v26 = vsub.s32 4, %v2895_v38 }
 0x57e   :  { %2341 = vmatprep.subr.bf16.mxu1 %v2628_v29 }
 0x581   :  { %v2569_v27 = vpop.eup %2568 }
 0x582   :  { %v777_v30 = vmul.f32 %v2569_v27, %v2565_v19  ;;  %v1033_v27 = vrot.slane %v2903_v40, %v1032_v26 }
 0x585   :  { %v2571_v28 = vpop.eup %2570 }
 0x586   :  { %v778_v31 = vmul.f32 %v2571_v28, %v2567_v21 }
 0x588   :  { %v779_v33 = vpack.c.bf16 %v778_v31, %v777_v30 }
 0x58a   :  { %2338 = vmatmul.mubr.msk.bf16.vlgmr.msra.gmra.mxu1 %vm755_vm4, %v779_v33 }
 0x58b   :  { %2342 = vmatpush3.bf16.xpose.msra.mxu1 %v838_v34  ;;  %2343 = vmatprep.mubr.msk.bf16.mxu1 %vm2629_vm2, %v2628_v29 }
 0x58c   :  { %2347 = vmatprep.subr.bf16.mxu1 %v2628_v29 }
 0x592   :  { %2344 = vmatmul.mubr.msk.bf16.vlgmr.msra.gmra.mxu1 %vm703_vm3, %v831_v35 }
 0x593   :  { %2349 = vmatprep.mubr.msk.bf16.mxu1 %vm2629_vm2, %v2628_v29 }
 0x64a   :  { %v2960_v36 = vpop.f32.mrf.mxu1 }
 0x64c   :  { %v2339_v37 = vpop.f32.mrf.mxu1 }
 0x64e   :  { %v2962_v41 = vpop.f32.mrf.mxu1 }
 0x650   :  { %v2340_v42 = vpop.f32.mrf.mxu1 }
 0x652   :  { %v874_v43 = vpop.f32.mrf.mxu1 }
 0x653   :  { %v881_v45 = vmul.f32 0.25, %v874_v43 }
 0x654   :  { %v2345_v46 = vpop.f32.mrf.mxu1 }
 0x655   :  { %v883_v47 = vadd.f32 %v881_v45, %v2935_v0 }
 0x656   :  { %v877_v48 = vpop.f32.mrf.mxu1 }
 0x657   :  { %v882_v49 = vmul.f32 0.25, %v877_v48  ;;  %v885_v50 = vsel %vm755_vm4, %v883_v47, -inf }
 0x658   :  { %886 = vmax.xlane.f32.xlu0 %v885_v50  ;;  %v2346_v51 = vpop.f32.mrf.mxu1 }
 0x659   :  { %v884_v52 = vadd.f32 %v882_v49, %v2941_v5  ;;  %v2536_v51 = vld [vmem:[%s3265_s7 + $0x8] sm:$0xff]  }
 0x65b   :  { %v888_v53 = vsel %vm759_vm5, %v884_v52, -inf }
 0x65c   :  { %889 = vmax.xlane.f32.xlu1 %v888_v53 }
 0x6e1   :  { %v887_v54 = vpop.xlane.xlu0 %886 }
 0x6e2   :  { %v891_v55 = vsub.f32 %v883_v47, %v887_v54 }
 0x6e4   :  { %v893_v56 = vmul.f32 1.442695, %v891_v55 }
 0x6e5   :  { %v890_v57 = vpop.xlane.xlu1 %889 }
 0x6e6   :  { %2572 = vpow2.f32 %v893_v56  ;;  %v892_v58 = vsub.f32 %v884_v52, %v890_v57  ;;  %v2537_v52 = vld [vmem:[%s3265_s7] sm:$0xff]  }
 0x6e8   :  { %v895_v59 = vmul.f32 1.442695, %v892_v58 }
 0x6ea   :  { %2574 = vpow2.f32 %v895_v59  ;;  %v1064_v59 = vsub.s32 2, %v2895_v38 }
 0x6f3   :  { %v2573_v61 = vpop.eup %2572 }
 0x6f4   :  { %v897_v62 = vsel %vm755_vm4, %v2573_v61, 0.0 }
 0x6f5   :  { %898 = vadd.xlane.f32.xlu0 %v897_v62 }
 0x6f7   :  { %v2575_v63 = vpop.eup %2574 }
 0x6f8   :  { %v900_v1 = vsel %vm759_vm5, %v2575_v63, 0.0 }
 0x6f9   :  { %901 = vadd.xlane.f32.xlu0 %v900_v1  ;;  %v1070_v1 = vsub.s32 3, %v2895_v38 }
 0x70f   :  { %908 = vrot.lane.b32.xlu0 %v2918_v60, %s2634_s19  ;;  %v2534_v60 = vld [vmem:[%s3264_s6 + $0x8] sm:$0xff]  }
 0x77e   :  { %v899_v2 = vpop.xlane.xlu0 %898 }
 0x77f   :  { %2576 = vrcp.f32 %v899_v2 }
 0x782   :  { %v902_v3 = vpop.xlane.xlu0 %901 }
 0x783   :  { %2578 = vrcp.f32 %v902_v3 }
 0x786   :  { %v909_v4 = vpop.permute.xlu0 %908 }
 0x787   :  { %v914_v6 = vsel %vm785_vm6, %v909_v4, 0 }
 0x788   :  { %2348 = vmatpush3.bf16.msra.mxu1 %v914_v6  ;;  %v1071_v6 = vrot.slane %v2903_v40, %v1070_v1 }
 0x789   :  { %2353 = vmatprep.subr.bf16.mxu1 %v2628_v29 }
 0x78c   :  { %v2577_v7 = vpop.eup %2576 }
 0x78d   :  { %v905_v9 = vmul.f32 %v2577_v7, %v2573_v61 }
 0x790   :  { %v2579_v8 = vpop.eup %2578 }
 0x791   :  { %v906_v10 = vmul.f32 %v2579_v8, %v2575_v63  ;;  %v1065_v63 = vrot.slane %v2903_v40, %v1064_v59 }
 0x793   :  { %v907_v12 = vpack.c.bf16 %v906_v10, %v905_v9 }
 0x795   :  { %2350 = vmatmul.mubr.msk.bf16.vlgmr.msra.gmra.mxu1 %vm755_vm4, %v907_v12  ;;  %v2538_v12 = vld [vmem:[%s3266_s9 + $0x38] sm:$0xff]  }
 0x796   :  { %2357 = vmatprep.mubr.msk.bf16.mxu1 %vm2629_vm2, %v2628_v29  ;;  %2354 = vmatpush3.bf16.msra.mxu1 %v2534_v60  ;;  %v2539_v60 = vld [vmem:[%s3266_s9 + $0x30] sm:$0xff]  }
 0x797   :  { %2355 = vmatprep.subr.bf16.mxu1 %v2628_v29 }
 0x79a   :  { %2356 = vmatpush3.bf16.msra.mxu1 %v2535_v13  ;;  %v2540_v13 = vld [vmem:[%s3266_s9 + $0x28] sm:$0xff]  }
 0x79b   :  { %2361 = vmatprep.subr.bf16.mxu1 %v2628_v29 }
 0x855   :  { %v950_v14 = vpop.f32.mrf.mxu1 }
 0x857   :  { %v2351_v15 = vpop.f32.mrf.mxu1 }
 0x858   :  { %v2542_v15 = vld [vmem:[%s3266_s9 + $0x18] sm:$0xff]  }
 0x859   :  { %v953_v17 = vpop.f32.mrf.mxu1 }
 0x85a   :  { %v2465_v18 = vpack.i.bf16 %v953_v17, %v950_v14  ;;  %v2541_v14 = vld [vmem:[%s3266_s9 + $0x20] sm:$0xff]   ;;  %v2543_v17 = vld [vmem:[%s3266_s9 + $0x10] sm:$0xff]  }
 0x85b   :  { %v2352_v19 = vpop.f32.mrf.mxu1 }
 0x85c   :  { %2466 = vrot.lane.b32.xlu1 %v2465_v18, %s2635_s23  ;;  %v2544_v18 = vld [vmem:[%s3266_s9 + $0x8] sm:$0xff]   ;;  %v2545_v19 = vld [vmem:[%s3266_s9] sm:$0xff]  }
 0x8ce   :  { %v2467_v20 = vpop.permute.xlu1 %2466 }
 0x8cf   :  { %v2469_v21 = vunpack.i.h.bf16 %v2467_v20  ;;  %v2468_v22 = vunpack.i.l.bf16 %v2467_v20  ;;  %v2137_v20 = vld [vmem:[%s3267_s8] ss:$0 sm:$0xff] }
 0x8d1   :  { %v966_v23 = vsel %vm703_vm3, %v2962_v41, %v2469_v21  ;;  %v965_v24 = vsel %vm703_vm3, %v2960_v36, %v2468_v22 }
 0x8d2   :  { %v967_v25 = vpack.c.bf16 %v966_v23, %v965_v24 }
 0x8d4   :  { %2358 = vmatmul.mubr.msk.bf16.vlgmr.msra.gmra.mxu1 %vm590_vm0, %v967_v25 }
 0x8d5   :  { %2365 = vmatprep.mubr.msk.bf16.mxu1 %vm2629_vm2, %v2628_v29  ;;  %2362 = vmatpush3.bf16.msra.mxu1 %v2536_v51 }
 0x8d6   :  { %2363 = vmatprep.subr.bf16.mxu1 %v2628_v29 }
 0x8d9   :  { %2364 = vmatpush3.bf16.msra.mxu1 %v2537_v52 }
 0x8da   :  { %2369 = vmatprep.subr.bf16.mxu1 %v2628_v29 }
 0x994   :  { %v1021_v28 = vpop.f32.mrf.mxu1 }
 0x995   :  { %v1028_v30 = vadd.f32 %v1021_v28, %v2869_v11 }
 0x996   :  { %v2359_v31 = vpop.f32.mrf.mxu1 }
 0x997   :  { %v2998_v32 = vadd.f32 %v1033_v27, %v1028_v30 }
 0x998   :  { %v1024_v33 = vpop.f32.mrf.mxu1 }
 0x999   :  { %v1029_v34 = vadd.f32 %v1024_v33, %v2873_v16  ;;  %v1036_v35 = vsel %vm590_vm0, %v2998_v32, 0.0 }
 0x99a   :  { %1037 = vadd.xlane.f32.xlu1 %v1036_v35  ;;  %v2360_v36 = vpop.f32.mrf.mxu1 }
 0x99b   :  { %v3003_v37 = vadd.f32 %v1033_v27, %v1029_v34 }
 0x99d   :  { %v1039_v41 = vsel %vm594_vm1, %v3003_v37, 0.0 }
 0x99e   :  { %1040 = vadd.xlane.f32.xlu0 %v1039_v41 }
 0xa23   :  { %v1038_v42 = vpop.xlane.xlu1 %1037 }
 0xa24   :  { %v1042_v43 = vmul.f32 0.03125, %v1038_v42 }
 0xa26   :  { %v1044_v11 = vsub.f32 %v2998_v32, %v1042_v43 }
 0xa27   :  { %v1041_v45 = vpop.xlane.xlu0 %1040 }
 0xa28   :  { %v1043_v46 = vmul.f32 0.03125, %v1041_v45  ;;  %v1046_v47 = vmul.f32 %v1044_v11, %v1044_v11 }
 0xa2a   :  { %v1045_v16 = vsub.f32 %v3003_v37, %v1043_v46  ;;  %v1048_v48 = vsel %vm590_vm0, %v1046_v47, 0.0 }
 0xa2b   :  { %1049 = vadd.xlane.f32.xlu0 %v1048_v48 }
 0xa2c   :  { %v1047_v49 = vmul.f32 %v1045_v16, %v1045_v16 }
 0xa2e   :  { %v1051_v50 = vsel %vm594_vm1, %v1047_v49, 0.0 }
 0xa2f   :  { %1052 = vadd.xlane.f32.xlu1 %v1051_v50 }
 0xab4   :  { %v1050_v53 = vpop.xlane.xlu0 %1049 }
 0xab5   :  { %v1054_v54 = vmul.f32 0.03125, %v1050_v53 }
 0xab7   :  { %v1056_v55 = vadd.f32 1e-06, %v1054_v54 }
 0xab8   :  { %v1053_v56 = vpop.xlane.xlu1 %1052 }
 0xab9   :  { %2580 = vrsqrt.f32 %v1056_v55  ;;  %v1055_v57 = vmul.f32 0.03125, %v1053_v56 }
 0xabb   :  { %v1057_v58 = vadd.f32 1e-06, %v1055_v57 }
 0xabd   :  { %2582 = vrsqrt.f32 %v1057_v58 }
 0xac6   :  { %v2581_v61 = vpop.eup %2580 }
 0xac7   :  { %v1060_v62 = vmul.f32 %v2581_v61, %v1044_v11 }
 0xac9   :  { %v1066_v4 = vmul.f32 %v1065_v63, %v1060_v62 }
 0xaca   :  { %v2583_v2 = vpop.eup %2582 }
 0xacb   :  { %v1061_v3 = vmul.f32 %v2583_v2, %v1045_v16  ;;  %v1072_v8 = vadd.f32 %v1071_v6, %v1066_v4 }
 0xacd   :  { %v1067_v7 = vmul.f32 %v1065_v63, %v1061_v3 }
 0xacf   :  { %v1073_v9 = vadd.f32 %v1071_v6, %v1067_v7 }
 0xad1   :  { %v1074_v10 = vpack.c.bf16 %v1073_v9, %v1072_v8 }
 0xad3   :  { %2366 = vmatmul.mubr.msk.bf16.vlgmr.msra.gmra.mxu1 %vm590_vm0, %v1074_v10 }
 0xad4   :  { %2385 = vmatprep.mubr.msk.bf16.mxu1 %vm2629_vm2, %v2628_v29  ;;  %2370 = vmatpush3.bf16.msra.mxu1 %v2538_v12 }
 0xad5   :  { %2371 = vmatprep.subr.bf16.mxu1 %v2628_v29 }
 0xad8   :  { %2372 = vmatpush3.bf16.msra.mxu1 %v2539_v60 }
 0xad9   :  { %2373 = vmatprep.subr.bf16.mxu1 %v2628_v29 }
 0xadc   :  { %2374 = vmatpush3.bf16.msra.mxu1 %v2540_v13 }
 0xadd   :  { %2375 = vmatprep.subr.bf16.mxu1 %v2628_v29 }
 0xae0   :  { %2376 = vmatpush3.bf16.msra.mxu1 %v2541_v14 }
 0xae1   :  { %2377 = vmatprep.subr.bf16.mxu1 %v2628_v29 }
 0xae4   :  { %2378 = vmatpush3.bf16.msra.mxu1 %v2542_v15 }
 0xae5   :  { %2379 = vmatprep.subr.bf16.mxu1 %v2628_v29 }
 0xae8   :  { %2380 = vmatpush3.bf16.msra.mxu1 %v2543_v17 }
 0xae9   :  { %2381 = vmatprep.subr.bf16.mxu1 %v2628_v29 }
 0xaec   :  { %2382 = vmatpush3.bf16.msra.mxu1 %v2544_v18 }
 0xaed   :  { %2383 = vmatprep.subr.bf16.mxu1 %v2628_v29 }
 0xaf0   :  { %2384 = vmatpush3.bf16.msra.mxu1 %v2545_v19 }
 0xaf1   :  { %2415 = vmatprep.subr.bf16.mxu1 %v2628_v29 }
 0xb93   :  { %v1135_v21 = vpop.f32.mrf.mxu1 }
 0xb94   :  { %v1136_v22 = vadd.f32 %v2137_v20, %v1135_v21 }
 0xb95   :  { %v2367_v23 = vpop.f32.mrf.mxu1 }
 0xb96   :  { %v1144_v24 = vmul.f32 0.70710677, %v1136_v22 }
 0xb97   :  { %v1138_v25 = vpop.f32.mrf.mxu1 }
 0xb98   :  { %v1146_v27 = vand.u32 2147483647, %v1144_v24  ;;  %v1139_v28 = vadd.f32 %v2137_v20, %v1138_v25  ;;  %vm1184_vm7 = vcmp.ge.f32.partialorder %v1144_v24, 0.0  ;;  %v1142_v20 = vmul.f32 0.5, %v1136_v22 }
 0xb99   :  { %v2368_v30 = vpop.f32.mrf.mxu1 }
 0xb9a   :  { %v1148_v31 = vmul.f32 0.3275911, %v1146_v27  ;;  %v1145_v33 = vmul.f32 0.70710677, %v1139_v28  ;;  %v1172_v42 = vsub.f32 0.0, %v1146_v27  ;;  %v1143_v21 = vmul.f32 0.5, %v1139_v28 }
 0xb9c   :  { %v1150_v34 = vadd.f32 1.0, %v1148_v31  ;;  %v1147_v35 = vand.u32 2147483647, %v1145_v33  ;;  %v1174_v43 = vmul.f32 %v1172_v42, %v1146_v27  ;;  %vm1185_vm8 = vcmp.ge.f32.partialorder %v1145_v33, 0.0 }
 0xb9d   :  { %v1304_v31 = vsub.s32 5, %v2895_v38 }
 0xb9e   :  { %2584 = vrcp.f32 %v1150_v34  ;;  %v1149_v36 = vmul.f32 0.3275911, %v1147_v35  ;;  %v1173_v11 = vsub.f32 0.0, %v1147_v35  ;;  %v1176_v47 = vmul.f32 1.442695, %v1174_v43 }
 0xb9f   :  { %v1305_v24 = vrot.slane %v2903_v40, %v1304_v31 }
 0xba0   :  { %v1151_v41 = vadd.f32 1.0, %v1149_v36  ;;  %v1175_v16 = vmul.f32 %v1173_v11, %v1147_v35 }
 0xba2   :  { %2586 = vrcp.f32 %v1151_v41  ;;  %v1178_v52 = vmul.f32 1.442695, %v1175_v16 }
 0xba3   :  { %2588 = vpow2.f32 %v1176_v47 }
 0xba4   :  { %2590 = vpow2.f32 %v1178_v52  ;;  %v2547_v52 = vld [vmem:[%s3260_s4 + $0x10] sm:$0xff]  }
 0xbab   :  { %v2585_v45 = vpop.eup %2584 }
 0xbac   :  { %v1154_v46 = vmul.f32 1.0614054, %v2585_v45 }
 0xbae   :  { %v1156_v48 = vadd.f32 -1.4531521, %v1154_v46 }
 0xbaf   :  { %v2587_v49 = vpop.eup %2586 }
 0xbb0   :  { %v1158_v50 = vmul.f32 %v2585_v45, %v1156_v48  ;;  %v1155_v51 = vmul.f32 1.0614054, %v2587_v49  ;;  %v2589_v6 = vpop.eup %2588 }
 0xbb1   :  { %v2591_v12 = vpop.eup %2590 }
 0xbb2   :  { %v1160_v53 = vadd.f32 1.4214138, %v1158_v50  ;;  %v1157_v54 = vadd.f32 -1.4531521, %v1155_v51  ;;  %v2546_v51 = vld [vmem:[%s3260_s4 + $0x18] sm:$0xff]  }
 0xbb3   :  { %2390 = vmatpush3.bf16.msra.mxu0 %v2546_v51 }
 0xbb4   :  { %v1162_v55 = vmul.f32 %v2585_v45, %v1160_v53  ;;  %v1159_v56 = vmul.f32 %v2587_v49, %v1157_v54  ;;  %2391 = vmatprep.subr.bf16.mxu0 %v2628_v29 }
 0xbb6   :  { %v1164_v57 = vadd.f32 -0.28449672, %v1162_v55  ;;  %v1161_v58 = vadd.f32 1.4214138, %v1159_v56 }
 0xbb7   :  { %2392 = vmatpush3.bf16.msra.mxu0 %v2547_v52 }
 0xbb8   :  { %v1166_v61 = vmul.f32 %v2585_v45, %v1164_v57  ;;  %v1163_v62 = vmul.f32 %v2587_v49, %v1161_v58  ;;  %2397 = vmatprep.subr.bf16.mxu0 %v2628_v29 }
 0xbba   :  { %v1168_v63 = vadd.f32 0.2548296, %v1166_v61  ;;  %v1165_v2 = vadd.f32 -0.28449672, %v1163_v62  ;;  %v3096_v61 = vld [vmem:[%s3261_s10 + $0x8] sm:$0x3f] }
 0xbbc   :  { %v1170_v3 = vmul.f32 %v2585_v45, %v1168_v63  ;;  %v1167_v4 = vmul.f32 %v2587_v49, %v1165_v2  ;;  %v1339_v2 = vrot.slane %v3096_v61, %v2898_v39 }
 0xbbe   :  { %v1180_v7 = vmul.f32 %v2589_v6, %v1170_v3  ;;  %v1169_v8 = vadd.f32 0.2548296, %v1167_v4 }
 0xbc0   :  { %v1182_v9 = vsub.f32 1.0, %v1180_v7  ;;  %v1171_v10 = vmul.f32 %v2587_v49, %v1169_v8  ;;  %v1345_v7 = vrot.slane %v3096_v61, %v2908_v44 }
 0xbc2   :  { %v1186_v60 = vsub.f32 0.0, %v1182_v9  ;;  %v1181_v13 = vmul.f32 %v2591_v12, %v1171_v10 }
 0xbc4   :  { %v1188_v14 = vsel %vm1184_vm7, %v1182_v9, %v1186_v60  ;;  %v1183_v15 = vsub.f32 1.0, %v1181_v13  ;;  %v2155_v13 = vld [vmem:[%s3262_s5 + $0x1] ss:$0 sm:$0xff] }
 0xbc5   :  { %v1190_v18 = vadd.f32 1.0, %v1188_v14 }
 0xbc6   :  { %v1187_v17 = vsub.f32 0.0, %v1183_v15 }
 0xbc7   :  { %v1192_v25 = vmul.f32 %v1190_v18, %v1142_v20 }
 0xbc8   :  { %v1189_v19 = vsel %vm1185_vm8, %v1183_v15, %v1187_v17 }
 0xbc9   :  { %v1191_v23 = vadd.f32 1.0, %v1189_v19 }
 0xbcb   :  { %v1193_v27 = vmul.f32 %v1191_v23, %v1143_v21 }
 0xbcd   :  { %v1194_v30 = vpack.c.bf16 %v1193_v27, %v1192_v25 }
 0xbcf   :  { %2386 = vmatmul.mubr.bf16.vlgmr.msra.gmra.mxu1 %v1194_v30 }
 0xbd0   :  { %2417 = vmatprep.mubr.msk.bf16.mxu1 %vm2629_vm2, %v2628_v29 }
 0xc8f   :  { %v1293_v34 = vpop.f32.mrf.mxu1 }
 0xc90   :  { %v1300_v33 = vadd.f32 %v1293_v34, %v2998_v32 }
 0xc91   :  { %v2387_v35 = vpop.f32.mrf.mxu1 }
 0xc92   :  { %v3072_v22 = vadd.f32 %v1305_v24, %v1300_v33 }
 0xc93   :  { %v1296_v28 = vpop.f32.mrf.mxu1 }
 0xc94   :  { %v1301_v36 = vadd.f32 %v1296_v28, %v3003_v37  ;;  %v1310_v41 = vsel %vm590_vm0, %v3072_v22, 0.0 }
 0xc95   :  { %1311 = vadd.xlane.f32.xlu0 %v1310_v41  ;;  %v2388_v42 = vpop.f32.mrf.mxu1 }
 0xc96   :  { %v3077_v43 = vadd.f32 %v1305_v24, %v1301_v36 }
 0xc98   :  { %v1313_v11 = vsel %vm594_vm1, %v3077_v43, 0.0 }
 0xc99   :  { %1314 = vadd.xlane.f32.xlu1 %v1313_v11 }
 0xd1e   :  { %v1312_v40 = vpop.xlane.xlu0 %1311 }
 0xd1f   :  { %v1316_v45 = vmul.f32 0.03125, %v1312_v40 }
 0xd21   :  { %v1318_v32 = vsub.f32 %v3072_v22, %v1316_v45 }
 0xd22   :  { %v1315_v46 = vpop.xlane.xlu1 %1314 }
 0xd23   :  { %v1317_v47 = vmul.f32 0.03125, %v1315_v46  ;;  %v1320_v16 = vmul.f32 %v1318_v32, %v1318_v32 }
 0xd25   :  { %v1319_v37 = vsub.f32 %v3077_v43, %v1317_v47  ;;  %v1322_v48 = vsel %vm590_vm0, %v1320_v16, 0.0 }
 0xd26   :  { %1323 = vadd.xlane.f32.xlu0 %v1322_v48 }
 0xd27   :  { %v1321_v49 = vmul.f32 %v1319_v37, %v1319_v37 }
 0xd29   :  { %v1325_v50 = vsel %vm594_vm1, %v1321_v49, 0.0 }
 0xd2a   :  { %1326 = vadd.xlane.f32.xlu1 %v1325_v50 }
 0xdaf   :  { %v1324_v53 = vpop.xlane.xlu0 %1323 }
 0xdb0   :  { %v1328_v54 = vmul.f32 0.03125, %v1324_v53 }
 0xdb2   :  { %v1330_v55 = vadd.f32 1e-06, %v1328_v54 }
 0xdb3   :  { %v1327_v56 = vpop.xlane.xlu1 %1326 }
 0xdb4   :  { %2592 = vrsqrt.f32 %v1330_v55  ;;  %v1329_v57 = vmul.f32 0.03125, %v1327_v56 }
 0xdb6   :  { %v1331_v58 = vadd.f32 1e-06, %v1329_v57 }
 0xdb8   :  { %2594 = vrsqrt.f32 %v1331_v58 }
 0xdc1   :  { %v2593_v62 = vpop.eup %2592 }
 0xdc2   :  { %v1334_v63 = vmul.f32 %v2593_v62, %v1318_v32 }
 0xdc4   :  { %v1340_v6 = vmul.f32 %v1339_v2, %v1334_v63 }
 0xdc5   :  { %v2595_v3 = vpop.eup %2594 }
 0xdc6   :  { %v1335_v4 = vmul.f32 %v2595_v3, %v1319_v37  ;;  %v1346_v9 = vadd.f32 %v1345_v7, %v1340_v6 }
 0xdc8   :  { %v1341_v8 = vmul.f32 %v1339_v2, %v1335_v4 }
 0xdca   :  { %v1347_v10 = vadd.f32 %v1345_v7, %v1341_v8 }
 0xdcc   :  { %v1348_v12 = vpack.c.bf16 %v1347_v10, %v1346_v9 }
 0xdce   :  { %2394 = vmatmul.mubr.msk.bf16.vlgmr.msra.gmra.mxu0 %vm590_vm0, %v1348_v12 }
 0xdcf   :  { %2399 = vmatprep.mubr.msk.bf16.mxu0 %vm2629_vm2, %v2628_v29 }
 0xe8e   :  { %v1411_v60 = vpop.f32.mrf.mxu0 }
 0xe8f   :  { %v1412_v17 = vadd.f32 %v2155_v13, %v1411_v60 }
 0xe90   :  { %v2395_v14 = vpop.f32.mrf.mxu0 }
 0xe92   :  { %v1414_v15 = vpop.f32.mrf.mxu0 }
 0xe93   :  { %v1415_v18 = vadd.f32 %v2155_v13, %v1414_v15 }
 0xe94   :  { %v2396_v19 = vpop.f32.mrf.mxu0 }
 0xe95   :  { %v3108_v20 = vpack.c.bf16 %v1415_v18, %v1412_v17 }
 0xe97   :  { %1420 = vrot.lane.b32.xlu0 %v3108_v20, %s2630_s30 }
 0xe9b   :  { %1547 = vrot.lane.b32.xlu0 %v3108_v20, %s2631_s13 }
 0xe9f   :  { %1545 = vrot.lane.b32.xlu0 %v3108_v20, %s2632_s14 }
 0xf09   :  { %v1421_v21 = vpop.permute.xlu0 %1420 }
 0xf0a   :  { %v1426_v23 = vsel %vm703_vm3, %v1421_v21, 0 }
 0xf0b   :  { %2398 = vmatpush3.bf16.xpose.msra.mxu0 %v1426_v23 }
 0xf0c   :  { %2403 = vmatprep.subr.bf16.mxu0 %v2628_v29 }
 0xf0d   :  { %v1548_v57 = vpop.permute.xlu0 %1547 }
 0xf0e   :  { %v1553_v62 = vsel %vm703_vm3, %v1548_v57, 0 }
 0xf11   :  { %v1546_v63 = vpop.permute.xlu0 %1545 }
 0xf12   :  { %2400 = vmatmul.mubr.msk.bf16.vlgmr.msra.gmra.mxu0 %vm703_vm3, %v3108_v20 }
 0xf13   :  { %2405 = vmatprep.mubr.msk.bf16.mxu0 %vm2629_vm2, %v2628_v29 }
 0xfd2   :  { %v1462_v25 = vpop.f32.mrf.mxu0 }
 0xfd3   :  { %v1469_v27 = vmul.f32 0.25, %v1462_v25 }
 0xfd4   :  { %v2401_v30 = vpop.f32.mrf.mxu0 }
 0xfd5   :  { %v1471_v24 = vadd.f32 %v1469_v27, %v2935_v0 }
 0xfd6   :  { %v1465_v34 = vpop.f32.mrf.mxu0 }
 0xfd7   :  { %v1470_v33 = vmul.f32 0.25, %v1465_v34  ;;  %v1473_v35 = vsel %vm755_vm4, %v1471_v24, -inf }
 0xfd8   :  { %1474 = vmax.xlane.f32.xlu1 %v1473_v35  ;;  %v2402_v28 = vpop.f32.mrf.mxu0 }
 0xfd9   :  { %v1472_v36 = vadd.f32 %v1470_v33, %v2941_v5 }
 0xfdb   :  { %v1476_v41 = vsel %vm759_vm5, %v1472_v36, -inf }
 0xfdc   :  { %1477 = vmax.xlane.f32.xlu1 %v1476_v41 }
0x1061   :  { %v1475_v42 = vpop.xlane.xlu1 %1474 }
0x1062   :  { %v1479_v11 = vsub.f32 %v1471_v24, %v1475_v42 }
0x1064   :  { %v1481_v40 = vmul.f32 1.442695, %v1479_v11 }
0x1065   :  { %v1478_v45 = vpop.xlane.xlu1 %1477 }
0x1066   :  { %2596 = vpow2.f32 %v1481_v40  ;;  %v1480_v32 = vsub.f32 %v1472_v36, %v1478_v45  ;;  %v2549_v45 = vld [vmem:[%s3264_s6 + $0x10] sm:$0xff]  }
0x1068   :  { %v1483_v46 = vmul.f32 1.442695, %v1480_v32 }
0x106a   :  { %2598 = vpow2.f32 %v1483_v46 }
0x1073   :  { %v2597_v47 = vpop.eup %2596 }
0x1074   :  { %v1485_v16 = vsel %vm755_vm4, %v2597_v47, 0.0 }
0x1075   :  { %1486 = vadd.xlane.f32.xlu1 %v1485_v16 }
0x1077   :  { %v2599_v37 = vpop.eup %2598 }
0x1078   :  { %v1488_v48 = vsel %vm759_vm5, %v2599_v37, 0.0 }
0x1079   :  { %1489 = vadd.xlane.f32.xlu1 %v1488_v48 }
0x108a   :  { %1496 = vrot.lane.b32.xlu1 %v3108_v20, %s2633_s3 }
0x10fe   :  { %v1487_v49 = vpop.xlane.xlu1 %1486 }
0x10ff   :  { %2600 = vrcp.f32 %v1487_v49 }
0x1102   :  { %v1490_v50 = vpop.xlane.xlu1 %1489 }
0x1103   :  { %2602 = vrcp.f32 %v1490_v50 }
0x1106   :  { %v1497_v51 = vpop.permute.xlu1 %1496 }
0x1107   :  { %v1502_v52 = vsel %vm785_vm6, %v1497_v51, 0 }
0x1108   :  { %2404 = vmatpush3.bf16.msra.mxu0 %v1502_v52 }
0x1109   :  { %2409 = vmatprep.subr.bf16.mxu0 %v2628_v29 }
0x110c   :  { %v2601_v53 = vpop.eup %2600 }
0x110d   :  { %v1493_v55 = vmul.f32 %v2601_v53, %v2597_v47 }
0x1110   :  { %v2603_v54 = vpop.eup %2602 }
0x1111   :  { %v1494_v56 = vmul.f32 %v2603_v54, %v2599_v37  ;;  %v1749_v54 = vrot.slane %v3096_v61, %v1032_v26 }
0x1113   :  { %v1495_v58 = vpack.c.bf16 %v1494_v56, %v1493_v55 }
0x1115   :  { %2406 = vmatmul.mubr.msk.bf16.vlgmr.msra.gmra.mxu0 %vm755_vm4, %v1495_v58 }
0x1116   :  { %2410 = vmatpush3.bf16.xpose.msra.mxu0 %v1553_v62  ;;  %2411 = vmatprep.mubr.msk.bf16.mxu0 %vm2629_vm2, %v2628_v29 }
0x1117   :  { %2421 = vmatprep.subr.bf16.mxu0 %v2628_v29 }
0x111d   :  { %2412 = vmatmul.mubr.msk.bf16.vlgmr.msra.gmra.mxu0 %vm703_vm3, %v1546_v63 }
0x111e   :  { %2425 = vmatprep.mubr.msk.bf16.mxu0 %vm2629_vm2, %v2628_v29 }
0x11d5   :  { %v3140_v2 = vpop.f32.mrf.mxu0 }
0x11d7   :  { %v2407_v3 = vpop.f32.mrf.mxu0 }
0x11d9   :  { %v1541_v4 = vpop.f32.mrf.mxu0 }
0x11db   :  { %v2408_v6 = vpop.f32.mrf.mxu0 }
0x11dd   :  { %v1589_v7 = vpop.f32.mrf.mxu0 }
0x11de   :  { %v1596_v8 = vmul.f32 0.25, %v1589_v7 }
0x11df   :  { %v2413_v9 = vpop.f32.mrf.mxu0 }
0x11e0   :  { %v1598_v10 = vadd.f32 %v1596_v8, %v2935_v0 }
0x11e1   :  { %v1592_v12 = vpop.f32.mrf.mxu0 }
0x11e2   :  { %v1597_v60 = vmul.f32 0.25, %v1592_v12  ;;  %v1600_v13 = vsel %vm755_vm4, %v1598_v10, -inf }
0x11e3   :  { %1601 = vmax.xlane.f32.xlu0 %v1600_v13  ;;  %v2414_v14 = vpop.f32.mrf.mxu0 }
0x11e4   :  { %v1599_v15 = vadd.f32 %v1597_v60, %v2941_v5  ;;  %v2550_v14 = vld [vmem:[%s3265_s7 + $0x18] sm:$0xff]  }
0x11e6   :  { %v1603_v17 = vsel %vm759_vm5, %v1599_v15, -inf }
0x11e7   :  { %1604 = vmax.xlane.f32.xlu1 %v1603_v17 }
0x126c   :  { %v1602_v18 = vpop.xlane.xlu0 %1601 }
0x126d   :  { %v1606_v19 = vsub.f32 %v1598_v10, %v1602_v18 }
0x126f   :  { %v1608_v21 = vmul.f32 1.442695, %v1606_v19 }
0x1270   :  { %v1605_v23 = vpop.xlane.xlu1 %1604 }
0x1271   :  { %2604 = vpow2.f32 %v1608_v21  ;;  %v1607_v25 = vsub.f32 %v1599_v15, %v1605_v23  ;;  %v2551_v15 = vld [vmem:[%s3265_s7 + $0x10] sm:$0xff]  }
0x1273   :  { %v1610_v27 = vmul.f32 1.442695, %v1607_v25 }
0x1275   :  { %2606 = vpow2.f32 %v1610_v27 }
0x127e   :  { %v2605_v0 = vpop.eup %2604 }
0x127f   :  { %v1612_v30 = vsel %vm755_vm4, %v2605_v0, 0.0 }
0x1280   :  { %1613 = vadd.xlane.f32.xlu0 %v1612_v30  ;;  %v1781_v30 = vrot.slane %v3096_v61, %v1064_v59  ;;  %v2553_v59 = vld [vmem:[%s3266_s9 + $0x70] sm:$0xff]  }
0x1282   :  { %v2607_v24 = vpop.eup %2606 }
0x1283   :  { %v1615_v34 = vsel %vm759_vm5, %v2607_v24, 0.0 }
0x1284   :  { %1616 = vadd.xlane.f32.xlu0 %v1615_v34 }
0x129a   :  { %1623 = vrot.lane.b32.xlu0 %v3108_v20, %s2634_s19  ;;  %v2548_v20 = vld [vmem:[%s3264_s6 + $0x18] sm:$0xff]  }
0x129b   :  { %2422 = vmatpush3.bf16.msra.mxu0 %v2548_v20  ;;  %v2557_v20 = vld [vmem:[%s3266_s9 + $0x50] sm:$0xff]  }
0x129c   :  { %2423 = vmatprep.subr.bf16.mxu0 %v2628_v29 }
0x129f   :  { %2424 = vmatpush3.bf16.msra.mxu0 %v2549_v45  ;;  %v2558_v45 = vld [vmem:[%s3266_s9 + $0x48] sm:$0xff]  }
0x12a0   :  { %2437 = vmatprep.subr.bf16.mxu0 %v2628_v29 }
0x1309   :  { %v1614_v5 = vpop.xlane.xlu0 %1613 }
0x130a   :  { %2608 = vrcp.f32 %v1614_v5 }
0x130d   :  { %v1617_v33 = vpop.xlane.xlu0 %1616 }
0x130e   :  { %2610 = vrcp.f32 %v1617_v33  ;;  %v1787_v33 = vrot.slane %v3096_v61, %v1070_v1  ;;  %v2554_v1 = vld [vmem:[%s3266_s9 + $0x68] sm:$0xff]  }
0x1311   :  { %v1624_v35 = vpop.permute.xlu0 %1623 }
0x1312   :  { %v1629_v28 = vsel %vm785_vm6, %v1624_v35, 0 }
0x1313   :  { %2416 = vmatpush3.bf16.msra.mxu1 %v1629_v28 }
0x1314   :  { %2429 = vmatprep.subr.bf16.mxu1 %v2628_v29 }
0x1317   :  { %v2609_v36 = vpop.eup %2608 }
0x1318   :  { %v1620_v42 = vmul.f32 %v2609_v36, %v2605_v0 }
0x131b   :  { %v2611_v41 = vpop.eup %2610 }
0x131c   :  { %v1621_v11 = vmul.f32 %v2611_v41, %v2607_v24 }
0x131e   :  { %v1622_v40 = vpack.c.bf16 %v1621_v11, %v1620_v42  ;;  %v2552_v42 = vld [vmem:[%s3266_s9 + $0x78] sm:$0xff]   ;;  %v2555_v11 = vld [vmem:[%s3266_s9 + $0x60] sm:$0xff]  }
0x1320   :  { %2418 = vmatmul.mubr.msk.bf16.vlgmr.msra.gmra.mxu1 %vm755_vm4, %v1622_v40  ;;  %v2556_v40 = vld [vmem:[%s3266_s9 + $0x58] sm:$0xff]  }
0x1321   :  { %2433 = vmatprep.mubr.msk.bf16.mxu1 %vm2629_vm2, %v2628_v29  ;;  %2430 = vmatpush3.bf16.msra.mxu1 %v2550_v14 }
0x1322   :  { %2431 = vmatprep.subr.bf16.mxu1 %v2628_v29 }
0x1325   :  { %2432 = vmatpush3.bf16.msra.mxu1 %v2551_v15 }
0x13e0   :  { %v1665_v32 = vpop.f32.mrf.mxu1 }
0x13e2   :  { %v2419_v46 = vpop.f32.mrf.mxu1 }
0x13e3   :  { %v2175_v46 = vld [vmem:[%s3267_s8 + $0x1] ss:$0 sm:$0xff] }
0x13e4   :  { %v1668_v47 = vpop.f32.mrf.mxu1 }
0x13e5   :  { %v2470_v16 = vpack.i.bf16 %v1668_v47, %v1665_v32  ;;  %v2559_v32 = vld [vmem:[%s3266_s9 + $0x40] sm:$0xff]  }
0x13e6   :  { %v2420_v37 = vpop.f32.mrf.mxu1 }
0x13e7   :  { %2471 = vrot.lane.b32.xlu1 %v2470_v16, %s2635_s23 }
0x1459   :  { %v2472_v48 = vpop.permute.xlu1 %2471 }
0x145a   :  { %v2474_v49 = vunpack.i.h.bf16 %v2472_v48  ;;  %v2473_v50 = vunpack.i.l.bf16 %v2472_v48 }
0x145c   :  { %v1681_v51 = vsel %vm703_vm3, %v1541_v4, %v2474_v49  ;;  %v1680_v52 = vsel %vm703_vm3, %v3140_v2, %v2473_v50 }
0x145d   :  { %v1682_v53 = vpack.c.bf16 %v1681_v51, %v1680_v52 }
0x145f   :  { %2426 = vmatmul.mubr.msk.bf16.vlgmr.msra.gmra.mxu0 %vm590_vm0, %v1682_v53 }
0x1460   :  { %2453 = vmatprep.mubr.msk.bf16.mxu0 %vm2629_vm2, %v2628_v29  ;;  %2438 = vmatpush3.bf16.msra.mxu0 %v2552_v42 }
0x1461   :  { %2439 = vmatprep.subr.bf16.mxu0 %v2628_v29 }
0x1464   :  { %2440 = vmatpush3.bf16.msra.mxu0 %v2553_v59 }
0x1465   :  { %2441 = vmatprep.subr.bf16.mxu0 %v2628_v29 }
0x1468   :  { %2442 = vmatpush3.bf16.msra.mxu0 %v2554_v1 }
0x1469   :  { %2443 = vmatprep.subr.bf16.mxu0 %v2628_v29 }
0x146c   :  { %2444 = vmatpush3.bf16.msra.mxu0 %v2555_v11 }
0x146d   :  { %2445 = vmatprep.subr.bf16.mxu0 %v2628_v29 }
0x1470   :  { %2446 = vmatpush3.bf16.msra.mxu0 %v2556_v40 }
0x1471   :  { %2447 = vmatprep.subr.bf16.mxu0 %v2628_v29 }
0x1474   :  { %2448 = vmatpush3.bf16.msra.mxu0 %v2557_v20 }
0x1475   :  { %2449 = vmatprep.subr.bf16.mxu0 %v2628_v29 }
0x1478   :  { %2450 = vmatpush3.bf16.msra.mxu0 %v2558_v45 }
0x1479   :  { %2451 = vmatprep.subr.bf16.mxu0 %v2628_v29 }
0x147c   :  { %2452 = vmatpush3.bf16.msra.mxu0 %v2559_v32 }
0x151f   :  { %v1737_v55 = vpop.f32.mrf.mxu0 }
0x1520   :  { %v1744_v56 = vadd.f32 %v1737_v55, %v3072_v22 }
0x1521   :  { %v2427_v57 = vpop.f32.mrf.mxu0 }
0x1522   :  { %v3174_v58 = vadd.f32 %v1749_v54, %v1744_v56 }
0x1523   :  { %v1740_v62 = vpop.f32.mrf.mxu0 }
0x1524   :  { %v1745_v63 = vadd.f32 %v1740_v62, %v3077_v43  ;;  %v1752_v2 = vsel %vm590_vm0, %v3174_v58, 0.0 }
0x1525   :  { %1753 = vadd.xlane.f32.xlu1 %v1752_v2  ;;  %v2428_v3 = vpop.f32.mrf.mxu0 }
0x1526   :  { %v3179_v4 = vadd.f32 %v1749_v54, %v1745_v63 }
0x1528   :  { %v1755_v6 = vsel %vm594_vm1, %v3179_v4, 0.0 }
0x1529   :  { %1756 = vadd.xlane.f32.xlu0 %v1755_v6 }
0x15ae   :  { %v1754_v26 = vpop.xlane.xlu1 %1753 }
0x15af   :  { %v1758_v7 = vmul.f32 0.03125, %v1754_v26 }
0x15b1   :  { %v1760_v22 = vsub.f32 %v3174_v58, %v1758_v7 }
0x15b2   :  { %v1757_v8 = vpop.xlane.xlu0 %1756 }
0x15b3   :  { %v1759_v9 = vmul.f32 0.03125, %v1757_v8  ;;  %v1762_v10 = vmul.f32 %v1760_v22, %v1760_v22 }
0x15b5   :  { %v1761_v43 = vsub.f32 %v3179_v4, %v1759_v9  ;;  %v1764_v12 = vsel %vm590_vm0, %v1762_v10, 0.0 }
0x15b6   :  { %1765 = vadd.xlane.f32.xlu0 %v1764_v12 }
0x15b7   :  { %v1763_v60 = vmul.f32 %v1761_v43, %v1761_v43 }
0x15b9   :  { %v1767_v13 = vsel %vm594_vm1, %v1763_v60, 0.0 }
0x15ba   :  { %1768 = vadd.xlane.f32.xlu1 %v1767_v13 }
0x163f   :  { %v1766_v17 = vpop.xlane.xlu0 %1765 }
0x1640   :  { %v1770_v18 = vmul.f32 0.03125, %v1766_v17 }
0x1642   :  { %v1772_v19 = vadd.f32 1e-06, %v1770_v18 }
0x1643   :  { %v1769_v21 = vpop.xlane.xlu1 %1768 }
0x1644   :  { %2612 = vrsqrt.f32 %v1772_v19  ;;  %v1771_v23 = vmul.f32 0.03125, %v1769_v21 }
0x1646   :  { %v1773_v25 = vadd.f32 1e-06, %v1771_v23 }
0x1648   :  { %2614 = vrsqrt.f32 %v1773_v25 }
0x1651   :  { %v2613_v27 = vpop.eup %2612 }
0x1652   :  { %v1776_v0 = vmul.f32 %v2613_v27, %v1760_v22 }
0x1654   :  { %v1782_v5 = vmul.f32 %v1781_v30, %v1776_v0 }
0x1655   :  { %v2615_v24 = vpop.eup %2614 }
0x1656   :  { %v1777_v34 = vmul.f32 %v2615_v24, %v1761_v43  ;;  %v1788_v28 = vadd.f32 %v1787_v33, %v1782_v5 }
0x1658   :  { %v1783_v35 = vmul.f32 %v1781_v30, %v1777_v34 }
0x165a   :  { %v1789_v36 = vadd.f32 %v1787_v33, %v1783_v35 }
0x165c   :  { %v1790_v41 = vpack.c.bf16 %v1789_v36, %v1788_v28 }
0x165e   :  { %2434 = vmatmul.mubr.msk.bf16.vlgmr.msra.gmra.mxu1 %vm590_vm0, %v1790_v41 }
0x171e   :  { %v1853_v47 = vpop.f32.mrf.mxu1 }
0x171f   :  { %v1854_v16 = vadd.f32 %v2175_v46, %v1853_v47  ;;  %v2024_v47 = vrot.slane %v3096_v61, %v1304_v31 }
0x1720   :  { %v2435_v37 = vpop.f32.mrf.mxu1 }
0x1721   :  { %v1862_v48 = vmul.f32 0.70710677, %v1854_v16  ;;  %v1860_v11 = vmul.f32 0.5, %v1854_v16 }
0x1722   :  { %v1856_v49 = vpop.f32.mrf.mxu1 }
0x1723   :  { %v1864_v50 = vand.u32 2147483647, %v1862_v48  ;;  %v1857_v51 = vadd.f32 %v2175_v46, %v1856_v49  ;;  %vm1902_vm9 = vcmp.ge.f32.partialorder %v1862_v48, 0.0 }
0x1724   :  { %v2436_v52 = vpop.f32.mrf.mxu1 }
0x1725   :  { %v1866_v53 = vmul.f32 0.3275911, %v1864_v50  ;;  %v1863_v54 = vmul.f32 0.70710677, %v1857_v51  ;;  %v1890_v62 = vsub.f32 0.0, %v1864_v50  ;;  %v1861_v40 = vmul.f32 0.5, %v1857_v51 }
0x1727   :  { %v1868_v29 = vadd.f32 1.0, %v1866_v53  ;;  %v1865_v55 = vand.u32 2147483647, %v1863_v54  ;;  %v1892_v63 = vmul.f32 %v1890_v62, %v1864_v50  ;;  %vm1903_vm10 = vcmp.ge.f32.partialorder %v1863_v54, 0.0 }
0x1729   :  { %2616 = vrcp.f32 %v1868_v29  ;;  %v1867_v56 = vmul.f32 0.3275911, %v1865_v55  ;;  %v1891_v2 = vsub.f32 0.0, %v1865_v55  ;;  %v1894_v26 = vmul.f32 1.442695, %v1892_v63 }
0x172b   :  { %v1869_v57 = vadd.f32 1.0, %v1867_v56  ;;  %v1893_v7 = vmul.f32 %v1891_v2, %v1865_v55 }
0x172d   :  { %2618 = vrcp.f32 %v1869_v57  ;;  %v1896_v43 = vmul.f32 1.442695, %v1893_v7 }
0x172e   :  { %2620 = vpow2.f32 %v1894_v26 }
0x172f   :  { %2622 = vpow2.f32 %v1896_v43 }
0x1736   :  { %v2617_v3 = vpop.eup %2616 }
0x1737   :  { %v1872_v6 = vmul.f32 1.0614054, %v2617_v3 }
0x1739   :  { %v1874_v22 = vadd.f32 -1.4531521, %v1872_v6 }
0x173a   :  { %v2619_v8 = vpop.eup %2618 }
0x173b   :  { %v1876_v9 = vmul.f32 %v2617_v3, %v1874_v22  ;;  %v1873_v10 = vmul.f32 1.0614054, %v2619_v8  ;;  %v2621_v0 = vpop.eup %2620 }
0x173c   :  { %v2623_v33 = vpop.eup %2622 }
0x173d   :  { %v1878_v12 = vadd.f32 1.4214138, %v1876_v9  ;;  %v1875_v60 = vadd.f32 -1.4531521, %v1873_v10 }
0x173f   :  { %v1880_v13 = vmul.f32 %v2617_v3, %v1878_v12  ;;  %v1877_v14 = vmul.f32 %v2619_v8, %v1875_v60 }
0x1741   :  { %v1882_v15 = vadd.f32 -0.28449672, %v1880_v13  ;;  %v1879_v17 = vadd.f32 1.4214138, %v1877_v14 }
0x1743   :  { %v1884_v18 = vmul.f32 %v2617_v3, %v1882_v15  ;;  %v1881_v19 = vmul.f32 %v2619_v8, %v1879_v17 }
0x1745   :  { %v1886_v21 = vadd.f32 0.2548296, %v1884_v18  ;;  %v1883_v23 = vadd.f32 -0.28449672, %v1881_v19 }
0x1747   :  { %v1888_v25 = vmul.f32 %v2617_v3, %v1886_v21  ;;  %v1885_v27 = vmul.f32 %v2619_v8, %v1883_v23 }
0x1749   :  { %v1898_v30 = vmul.f32 %v2621_v0, %v1888_v25  ;;  %v1887_v24 = vadd.f32 0.2548296, %v1885_v27 }
0x174b   :  { %v1900_v34 = vsub.f32 1.0, %v1898_v30  ;;  %v1889_v5 = vmul.f32 %v2619_v8, %v1887_v24  ;;  %v2027_v8 = vld [vmem:[%s3268_s11] sm:$0x3] }
0x174c   :  { %v2057_v9 = vrot.slane %v2027_v8, %v2898_v39  ;;  %v2063_v43 = vrot.slane %v2027_v8, %v2908_v44 }
0x174d   :  { %v1904_v35 = vsub.f32 0.0, %v1900_v34  ;;  %v1899_v28 = vmul.f32 %v2623_v33, %v1889_v5 }
0x174f   :  { %v1906_v36 = vsel %vm1902_vm9, %v1900_v34, %v1904_v35  ;;  %v1901_v41 = vsub.f32 1.0, %v1899_v28 }
0x1750   :  { %v1908_v59 = vadd.f32 1.0, %v1906_v36 }
0x1751   :  { %v1905_v42 = vsub.f32 0.0, %v1901_v41 }
0x1752   :  { %v1910_v45 = vmul.f32 %v1908_v59, %v1860_v11 }
0x1753   :  { %v1907_v1 = vsel %vm1903_vm10, %v1901_v41, %v1905_v42 }
0x1754   :  { %v1909_v20 = vadd.f32 1.0, %v1907_v1 }
0x1756   :  { %v1911_v32 = vmul.f32 %v1909_v20, %v1861_v40 }
0x1758   :  { %v1912_v46 = vpack.c.bf16 %v1911_v32, %v1910_v45 }
0x175a   :  { %2454 = vmatmul.mubr.bf16.vlgmr.msra.gmra.mxu0 %v1912_v46 }
0x181a   :  { %v2012_v37 = vpop.f32.mrf.mxu0 }
0x181b   :  { %v2019_v48 = vadd.f32 %v2012_v37, %v3174_v58 }
0x181c   :  { %v2455_v49 = vpop.f32.mrf.mxu0 }
0x181d   :  { %v2025_v50 = vadd.f32 %v2024_v47, %v2019_v48 }
0x181e   :  { %v2015_v52 = vpop.f32.mrf.mxu0 }
0x181f   :  { %v2020_v53 = vadd.f32 %v2015_v52, %v3179_v4  ;;  %v2028_v16 = vsel %vm590_vm0, %v2025_v50, 0.0 }
0x1820   :  { %2029 = vadd.xlane.f32.xlu0 %v2028_v16  ;;  %v2456_v51 = vpop.f32.mrf.mxu0 }
0x1821   :  { %v2026_v54 = vadd.f32 %v2024_v47, %v2020_v53 }
0x1823   :  { %v2031_v29 = vsel %vm594_vm1, %v2026_v54, 0.0 }
0x1824   :  { %2032 = vadd.xlane.f32.xlu1 %v2031_v29 }
0x18a9   :  { %v2030_v55 = vpop.xlane.xlu0 %2029 }
0x18aa   :  { %v2034_v38 = vmul.f32 0.03125, %v2030_v55 }
0x18ac   :  { %v2036_v56 = vsub.f32 %v2025_v50, %v2034_v38 }
0x18ad   :  { %v2033_v31 = vpop.xlane.xlu1 %2032 }
0x18ae   :  { %v2035_v61 = vmul.f32 0.03125, %v2033_v31  ;;  %v2038_v57 = vmul.f32 %v2036_v56, %v2036_v56 }
0x18b0   :  { %v2037_v58 = vsub.f32 %v2026_v54, %v2035_v61  ;;  %v2040_v62 = vsel %vm590_vm0, %v2038_v57, 0.0 }
0x18b1   :  { %2041 = vadd.xlane.f32.xlu0 %v2040_v62 }
0x18b2   :  { %v2039_v63 = vmul.f32 %v2037_v58, %v2037_v58 }
0x18b4   :  { %v2043_v4 = vsel %vm594_vm1, %v2039_v63, 0.0 }
0x18b5   :  { %2044 = vadd.xlane.f32.xlu1 %v2043_v4 }
0x193a   :  { %v2042_v2 = vpop.xlane.xlu0 %2041 }
0x193b   :  { %v2046_v3 = vmul.f32 0.03125, %v2042_v2 }
0x193d   :  { %v2048_v6 = vadd.f32 1e-06, %v2046_v3 }
0x193e   :  { %v2045_v26 = vpop.xlane.xlu1 %2044 }
0x193f   :  { %2624 = vrsqrt.f32 %v2048_v6  ;;  %v2047_v7 = vmul.f32 0.03125, %v2045_v26 }
0x1941   :  { %v2049_v22 = vadd.f32 1e-06, %v2047_v7 }
0x1943   :  { %2626 = vrsqrt.f32 %v2049_v22 }
0x194c   :  { %v2625_v10 = vpop.eup %2624 }
0x194d   :  { %v2052_v12 = vmul.f32 %v2625_v10, %v2036_v56 }
0x194f   :  { %v2058_v60 = vmul.f32 %v2057_v9, %v2052_v12 }
0x1950   :  { %v2627_v13 = vpop.eup %2626 }
0x1951   :  { %v2064_v14 = vadd.f32 %v2063_v43, %v2058_v60  ;;  %v2053_v15 = vmul.f32 %v2627_v13, %v2037_v58 }
0x1953   :  { %2066 = vst.msk [vmem:[%s3269_s12] sm:$0xff] %vm590_vm0, %v2064_v14  ;;  %v2059_v17 = vmul.f32 %v2057_v9, %v2053_v15 }
0x1955   :  { %v2065_v18 = vadd.f32 %v2063_v43, %v2059_v17 }
0x1957   :  { %2067 = vst.msk [vmem:[%s3269_s12 + $0x8] sm:$0x3] %vm594_vm1, %v2065_v18 }

</bundles_post_ra>
